<compile_context>
chip_gen: v5e
topology: v5e:2x2
jax: 0.10.0
libtpu: 0.0.40
codegen_flags: <defaults>
</compile_context>

<pallas_src>
import numpy as np
import jax
import jax.numpy as jnp
from jax.experimental import pallas as pl
from jax.experimental.pallas import tpu as pltpu


# TODO(synk): torch nn.GELU defaults to the exact erf form; the tanh
# approximation (max abs deviation ~3e-4) is used so the op maps to the EUP on
# all TPU generations (v5e has no cheap erf path). Swap in jax.lax.erf if a
# bit-faithful GELU is required.
def _gelu(x):
    return 0.5 * x * (1.0 + jnp.tanh(0.7978845608028654 * (x + 0.044715 * x * x * x)))


def _dotb(a, w_bf16):
    # bf16 operands, f32 accumulation on the MXU.
    return jnp.dot(a.astype(jnp.bfloat16), w_bf16, preferred_element_type=jnp.float32)


# =====================================================================
# Fused Pallas kernel: the whole StackMetaFormers forward in one pallas_call.
# =====================================================================
def _stack_kernel(key_ref, other_ref, posk_ref, poso_ref,
                  wc_ref, wh_ref, wp_ref, vec_ref,
                  out_ref, kf_ref):
    l = pl.program_id(1)
    Nk, C = kf_ref.shape
    M = other_ref.shape[1]
    H = wp_ref.shape[2]

    # Layer 0: seed the resident key-feature accumulator for this batch element.
    @pl.when(l == 0)
    def _():
        kf_ref[...] = key_ref[0]

    kf = kf_ref[...]                       # (Nk, C) f32, carried across layers
    other = other_ref[0]                   # (M, C)  neighbor feats (static across layers)
    pk = posk_ref[0]                       # (Nk, P)
    po = poso_ref[0]                       # (M, P)

    # Per-layer parameter slabs (resident in VMEM for the whole grid).
    wc = wc_ref[l]                         # (C, 3C+2H) bf16: wq | wk | wv | wm1 | w1
    wh = wh_ref[l]                         # (H, 3C)    bf16: wpe2 | wm2 | w2
    wpe1 = wp_ref[l]                       # (P, H)     bf16
    vec = vec_ref[l]                       # (10, H)    f32 scale / shift / bias rows

    wq, wk, wv = wc[:, 0:C], wc[:, C:2 * C], wc[:, 2 * C:3 * C]
    wm1, w1 = wc[:, 3 * C:3 * C + H], wc[:, 3 * C + H:3 * C + 2 * H]
    wpe2, wm2, w2 = wh[:, 0:C], wh[:, C:2 * C], wh[:, 2 * C:3 * C]
    pe_scale, pe_shift = vec[0:1, :], vec[1:2, :]
    m_scale, m_shift = vec[2:3, :], vec[3:4, :]
    b1 = vec[4:5, :]
    bn_mix_s, bn_mix_b = vec[5:6, :C], vec[6:7, :C]
    bn_mlp_s, bn_mlp_b = vec[7:8, :C], vec[8:9, :C]
    b2 = vec[9:10, :C]

    # ---- global_mixing: norm_in_mixer (folded BN1d) -> VectorAttentionLayerV3
    keyn = kf * bn_mix_s + bn_mix_b                                    # (Nk, C)
    q = _dotb(keyn, wq)                                                # (Nk, C)
    k = _dotb(other, wk)                                               # (M, C)
    v = _dotb(other, wv)                                               # (M, C)

    # pos_encoder conv1 distributed over the pairwise difference:
    #   (pk_i - po_j) @ Wpe1 == pk_i @ Wpe1 - po_j @ Wpe1
    # so the (Nk*M, P) operand is never materialized (and 4x fewer flops).
    apk = _dotb(pk, wpe1)                                              # (Nk, H)
    apo = _dotb(po, wpe1)                                              # (M, H)
    h = (apk[:, None, :] - apo[None, :, :]) * pe_scale + pe_shift      # (Nk, M, H)
    pe2 = _dotb(_gelu(h).reshape(Nk * M, H), wpe2)                     # (Nk*M, C)

    # attention-logit MLP: conv(C->H) -> BN2d -> ReLU -> conv(H->C)
    attn = (q[:, None, :] - k[None, :, :]).reshape(Nk * M, C) + pe2    # (Nk*M, C)
    h2 = jnp.maximum(_dotb(attn, wm1) * m_scale + m_shift, 0.0)        # (Nk*M, H)
    logits = _dotb(h2, wm2).reshape(Nk, M, C)                          # (Nk, M, C)

    # softmax over neighbors; a single (Nk, C) reciprocal replaces the
    # (Nk, M, C) elementwise divide.
    pe3 = pe2.reshape(Nk, M, C)
    e = jnp.exp(logits - jnp.max(logits, axis=1, keepdims=True))
    denom = jnp.sum(e, axis=1)                                         # (Nk, C)
    num = jnp.sum(e * (v[None, :, :] + pe3), axis=1)                   # (Nk, C)
    kf = kf + num * pl.reciprocal(denom, approx=False)    # residual; drop_path = id (eval)

    # ---- token MLP: norm_in_mlp (folded BN1d) -> Linear -> GELU -> Linear
    keyn2 = kf * bn_mlp_s + bn_mlp_b
    hm = _gelu(_dotb(keyn2, w1) + b1)                                  # (Nk, H)
    kf = kf + _dotb(hm, w2) + b2                                       # (Nk, C)

    kf_ref[...] = kf
    # HBM writeback only happens when the batch index changes (or at grid end).
    out_ref[0] = kf


# =====================================================================
# Wrapper: slab packing + single pallas_call over the whole stack.
# =====================================================================
def _pack_params(layer_params, C, P, H):
    assert H >= C, "packing assumes hidden dim >= channel dim (hidden_scale >= 1)"
    pad = lambda vv: jnp.pad(vv, (0, H - vv.shape[0]))
    wc = jnp.stack([jnp.concatenate(
            [p["wq"], p["wk"], p["wv"], p["wm1"], p["w1"]], axis=1)
        for p in layer_params]).astype(jnp.bfloat16)                  # (L, C, 3C+2H)
    wh = jnp.stack([jnp.concatenate(
            [p["wpe2"], p["wm2"], p["w2"]], axis=1)
        for p in layer_params]).astype(jnp.bfloat16)                  # (L, H, 3C)
    wp = jnp.stack([p["wpe1"] for p in layer_params]).astype(jnp.bfloat16)  # (L, P, H)
    vec = jnp.stack([jnp.stack([
            p["pe_scale"], p["pe_shift"], p["m_scale"], p["m_shift"], p["b1"],
            pad(p["bn_mix_scale"]), pad(p["bn_mix_shift"]),
            pad(p["bn_mlp_scale"]), pad(p["bn_mlp_shift"]), pad(p["b2"])])
        for p in layer_params]).astype(jnp.float32)                   # (L, 10, H)
    return wc, wh, wp, vec


def stack_metaformers_apply(layer_params, feat, pos_emb, n_key):
    B, N, C = feat.shape
    P = pos_emb.shape[2]
    M = N - n_key
    L = len(layer_params)
    H = layer_params[0]["w1"].shape[1]

    # Key / neighbor halves passed separately: `other` and the position
    # embeddings never change across layers, so nothing is re-concatenated.
    key_in = feat[:, :n_key]
    other = feat[:, n_key:]
    pk = pos_emb[:, :n_key]
    po = pos_emb[:, n_key:]
    wc, wh, wp, vec = _pack_params(layer_params, C, P, H)

    grid_spec = pltpu.PrefetchScalarGridSpec(
        num_scalar_prefetch=0,
        grid=(B, L),                     # layers innermost -> sequential carry per batch
        in_specs=[
            pl.BlockSpec((1, n_key, C), lambda b, l: (b, 0, 0)),
            pl.BlockSpec((1, M, C), lambda b, l: (b, 0, 0)),
            pl.BlockSpec((1, n_key, P), lambda b, l: (b, 0, 0)),
            pl.BlockSpec((1, M, P), lambda b, l: (b, 0, 0)),
            # parameter slabs: full-array blocks with constant index maps ->
            # DMA'd once and kept resident in VMEM for the whole grid.
            pl.BlockSpec((L, C, 3 * C + 2 * H), lambda b, l: (0, 0, 0)),
            pl.BlockSpec((L, H, 3 * C), lambda b, l: (0, 0, 0)),
            pl.BlockSpec((L, P, H), lambda b, l: (0, 0, 0)),
            pl.BlockSpec((L, 10, H), lambda b, l: (0, 0, 0)),
        ],
        out_specs=pl.BlockSpec((1, n_key, C), lambda b, l: (b, 0, 0)),
        scratch_shapes=[pltpu.VMEM((n_key, C), jnp.float32)],
    )
    return pl.pallas_call(
        _stack_kernel,
        out_shape=jax.ShapeDtypeStruct((B, n_key, C), jnp.float32),
        grid_spec=grid_spec,
        compiler_params=pltpu.CompilerParams(
            # B parallel -> both TensorCores on v7x; layer axis carries state.
            dimension_semantics=("parallel", "arbitrary"),
            vmem_limit_bytes=32 * 1024 * 1024,
        ),
    )(key_in, other, pk, po, wc, wh, wp, vec)


# =====================================================================
# Pure-JAX reference (correctness check): algebraically identical to the
# PyTorch eval-mode forward and uses the same bf16-operand / f32-accumulate
# policy as the kernel, so the tight tolerance is meaningful.
# =====================================================================
def _dotb_ref(a, w):
    return jnp.einsum("...i,io->...o", a.astype(jnp.bfloat16), w.astype(jnp.bfloat16),
                      preferred_element_type=jnp.float32)


def _stack_ref(layer_params, feat, pos_emb, n_key):
    key = feat[:, :n_key]
    other = feat[:, n_key:]
    pk = pos_emb[:, :n_key]
    po = pos_emb[:, n_key:]
    kf = key
    for p in layer_params:
        keyn = kf * p["bn_mix_scale"] + p["bn_mix_shift"]
        q = _dotb_ref(keyn, p["wq"])
        k = _dotb_ref(other, p["wk"])
        v = _dotb_ref(other, p["wv"])
        apk = _dotb_ref(pk, p["wpe1"])
        apo = _dotb_ref(po, p["wpe1"])
        h = (apk[:, :, None, :] - apo[:, None, :, :]) * p["pe_scale"] + p["pe_shift"]
        pe = _dotb_ref(_gelu(h), p["wpe2"])                            # (B, Nk, M, C)
        attn = q[:, :, None, :] - k[:, None, :, :] + pe
        h2 = jnp.maximum(_dotb_ref(attn, p["wm1"]) * p["m_scale"] + p["m_shift"], 0.0)
        logits = _dotb_ref(h2, p["wm2"])
        wsm = jax.nn.softmax(logits, axis=2)
        kf = kf + jnp.sum(wsm * (v[:, None, :, :] + pe), axis=2)
        keyn2 = kf * p["bn_mlp_scale"] + p["bn_mlp_shift"]
        hm = _gelu(_dotb_ref(keyn2, p["w1"]) + p["b1"])
        kf = kf + _dotb_ref(hm, p["w2"]) + p["b2"]
    return kf


# =====================================================================
# Deterministic parameter initialization (eval-mode BN folded to scale/shift)
# =====================================================================
def _bn_fold(kg, kb, km, kv, n, eps=1e-5):
    gamma = 1.0 + 0.1 * jax.random.normal(kg, (n,), jnp.float32)
    beta = 0.1 * jax.random.normal(kb, (n,), jnp.float32)
    mean = 0.1 * jax.random.normal(km, (n,), jnp.float32)
    var = 1.0 + 0.1 * jnp.abs(jax.random.normal(kv, (n,), jnp.float32))
    scale = gamma / jnp.sqrt(var + eps)
    shift = beta - mean * scale
    return scale, shift


def init_metaformer_params(key, C, P, H):
    ks = jax.random.split(key, 27)
    w = lambda k, s: 0.2 * jax.random.normal(k, s, jnp.float32)
    bn_mix_scale, bn_mix_shift = _bn_fold(ks[0], ks[1], ks[2], ks[3], C)
    bn_mlp_scale, bn_mlp_shift = _bn_fold(ks[4], ks[5], ks[6], ks[7], C)
    m_scale, m_shift = _bn_fold(ks[8], ks[9], ks[10], ks[11], H)
    pe_scale, pe_shift = _bn_fold(ks[12], ks[13], ks[14], ks[15], H)
    return {
        "bn_mix_scale": bn_mix_scale, "bn_mix_shift": bn_mix_shift,
        "bn_mlp_scale": bn_mlp_scale, "bn_mlp_shift": bn_mlp_shift,
        "wq": w(ks[16], (C, C)), "wk": w(ks[17], (C, C)), "wv": w(ks[18], (C, C)),
        "wm1": w(ks[19], (C, H)), "wm2": w(ks[20], (H, C)),
        "m_scale": m_scale, "m_shift": m_shift,
        "wpe1": w(ks[21], (P, H)), "wpe2": w(ks[22], (H, C)),
        "pe_scale": pe_scale, "pe_shift": pe_shift,
        "w1": w(ks[23], (C, H)),
        "b1": 0.1 * jax.random.normal(ks[24], (H,), jnp.float32),
        "w2": w(ks[25], (H, C)),
        "b2": 0.1 * jax.random.normal(ks[26], (C,), jnp.float32),
    }


# =====================================================================
if __name__ == "__main__":
    # StackMetaFormers(n_transformers=2, d=32, d_pos_emb=16, hidden_scale=2.0)
    B, N, n_key_token = 2, 16, 8          # M = N - n_key_token = 8 neighbors
    C, P = 32, 16
    H = int(C * 2.0)
    n_transformers = 2

    key = jax.random.PRNGKey(0)
    kfeat, kpos, *lkeys = jax.random.split(key, 2 + n_transformers)
    feat = jax.random.normal(kfeat, (B, N, C), dtype=jnp.float32)
    pos_emb = jax.random.normal(kpos, (B, N, P), dtype=jnp.float32)
    params = [init_metaformer_params(lk, C, P, H) for lk in lkeys]

    out = jax.block_until_ready(stack_metaformers_apply(params, feat, pos_emb, n_key_token))
    assert out.shape == (B, n_key_token, C)

    ref = jax.block_until_ready(_stack_ref(params, feat, pos_emb, n_key_token))
    np.testing.assert_allclose(np.asarray(out), np.asarray(ref), rtol=2e-3, atol=2e-3)

    print("KERNEL_OK")
</pallas_src>

<mosaic_0001>
module attributes {stable_mosaic.version = 11 : i64} {
  func.func @_stack_kernel(%arg0: i32, %arg1: i32, %arg2: memref<1x8x32xf32, #tpu.memory_space<vmem>>, %arg3: memref<1x8x32xf32, #tpu.memory_space<vmem>>, %arg4: memref<1x8x16xf32, #tpu.memory_space<vmem>>, %arg5: memref<1x8x16xf32, #tpu.memory_space<vmem>>, %arg6: memref<2x32x224xbf16, #tpu.memory_space<vmem>>, %arg7: memref<2x64x96xbf16, #tpu.memory_space<vmem>>, %arg8: memref<2x16x64xbf16, #tpu.memory_space<vmem>>, %arg9: memref<2x10x64xf32, #tpu.memory_space<vmem>>, %arg10: memref<1x8x32xf32, #tpu.memory_space<vmem>>, %arg11: memref<8x32xf32, #tpu.memory_space<vmem>>) attributes {dimension_semantics = [#tpu.dimension_semantics<parallel>, #tpu.dimension_semantics<arbitrary>], iteration_bounds = array<i64: 2, 2>, scalar_prefetch = 0 : i64, scratch_operands = 1 : i64, tpu.core_type = #tpu.core_type<tc>, window_params = [{transform_indices = @transform_0, window_bounds = array<i64: 1, 8, 32>}, {transform_indices = @transform_1, window_bounds = array<i64: 1, 8, 32>}, {transform_indices = @transform_2, window_bounds = array<i64: 1, 8, 16>}, {transform_indices = @transform_3, window_bounds = array<i64: 1, 8, 16>}, {pipeline_mode = #tpu.pipeline_mode<synchronous>, transform_indices = @transform_4, window_bounds = array<i64: 2, 32, 224>}, {pipeline_mode = #tpu.pipeline_mode<synchronous>, transform_indices = @transform_5, window_bounds = array<i64: 2, 64, 96>}, {pipeline_mode = #tpu.pipeline_mode<synchronous>, transform_indices = @transform_6, window_bounds = array<i64: 2, 16, 64>}, {pipeline_mode = #tpu.pipeline_mode<synchronous>, transform_indices = @transform_7, window_bounds = array<i64: 2, 10, 64>}, {transform_indices = @transform_8, window_bounds = array<i64: 1, 8, 32>}]} {
    %c0_i32 = arith.constant 0 : i32
    %0 = arith.cmpi eq, %arg1, %c0_i32 : i32
    %1 = arith.extui %0 : i1 to i32
    %c0_i32_0 = arith.constant 0 : i32
    %2 = arith.cmpi ne, %1, %c0_i32_0 : i32
    scf.if %2 {
      %c0_45 = arith.constant 0 : index
      %c0_46 = arith.constant 0 : index
      %c0_47 = arith.constant 0 : index
      %144 = vector.load %arg2[%c0_45, %c0_46, %c0_47] : memref<1x8x32xf32, #tpu.memory_space<vmem>>, vector<1x8x32xf32>
      %145 = vector.shape_cast %144 : vector<1x8x32xf32> to vector<8x32xf32>
      %c0_48 = arith.constant 0 : index
      %c0_49 = arith.constant 0 : index
      %146 = vector.load %arg11[%c0_48, %c0_49] : memref<8x32xf32, #tpu.memory_space<vmem>>, vector<8x32xf32>
      tpu.vector_store %arg11[%c0_48, %c0_49], %145 {strides = array<i32>} : memref<8x32xf32, #tpu.memory_space<vmem>>, vector<8x32xf32>,
    } else {
    }
    %c0 = arith.constant 0 : index
    %c0_1 = arith.constant 0 : index
    %3 = vector.load %arg11[%c0, %c0_1] : memref<8x32xf32, #tpu.memory_space<vmem>>, vector<8x32xf32>
    %c0_2 = arith.constant 0 : index
    %c0_3 = arith.constant 0 : index
    %c0_4 = arith.constant 0 : index
    %4 = vector.load %arg3[%c0_2, %c0_3, %c0_4] : memref<1x8x32xf32, #tpu.memory_space<vmem>>, vector<1x8x32xf32>
    %5 = vector.shape_cast %4 : vector<1x8x32xf32> to vector<8x32xf32>
    %c0_5 = arith.constant 0 : index
    %c0_6 = arith.constant 0 : index
    %c0_7 = arith.constant 0 : index
    %6 = vector.load %arg4[%c0_5, %c0_6, %c0_7] : memref<1x8x16xf32, #tpu.memory_space<vmem>>, vector<1x8x16xf32>
    %7 = vector.shape_cast %6 : vector<1x8x16xf32> to vector<8x16xf32>
    %c0_8 = arith.constant 0 : index
    %c0_9 = arith.constant 0 : index
    %c0_10 = arith.constant 0 : index
    %8 = vector.load %arg5[%c0_8, %c0_9, %c0_10] : memref<1x8x16xf32, #tpu.memory_space<vmem>>, vector<1x8x16xf32>
    %9 = vector.shape_cast %8 : vector<1x8x16xf32> to vector<8x16xf32>
    %10 = arith.index_cast %arg1 : i32 to index
    %c0_11 = arith.constant 0 : index
    %c0_12 = arith.constant 0 : index
    %11 = vector.load %arg6[%10, %c0_11, %c0_12] : memref<2x32x224xbf16, #tpu.memory_space<vmem>>, vector<1x32x224xbf16>
    %12 = vector.shape_cast %11 : vector<1x32x224xbf16> to vector<32x224xbf16>
    %13 = arith.index_cast %arg1 : i32 to index
    %c0_13 = arith.constant 0 : index
    %c0_14 = arith.constant 0 : index
    %14 = vector.load %arg7[%13, %c0_13, %c0_14] : memref<2x64x96xbf16, #tpu.memory_space<vmem>>, vector<1x64x96xbf16>
    %15 = vector.shape_cast %14 : vector<1x64x96xbf16> to vector<64x96xbf16>
    %16 = arith.index_cast %arg1 : i32 to index
    %c0_15 = arith.constant 0 : index
    %c0_16 = arith.constant 0 : index
    %17 = vector.load %arg8[%16, %c0_15, %c0_16] : memref<2x16x64xbf16, #tpu.memory_space<vmem>>, vector<1x16x64xbf16>
    %18 = vector.shape_cast %17 : vector<1x16x64xbf16> to vector<16x64xbf16>
    %19 = arith.index_cast %arg1 : i32 to index
    %c0_17 = arith.constant 0 : index
    %c0_18 = arith.constant 0 : index
    %20 = vector.load %arg9[%19, %c0_17, %c0_18] : memref<2x10x64xf32, #tpu.memory_space<vmem>>, vector<1x10x64xf32>
    %21 = vector.shape_cast %20 : vector<1x10x64xf32> to vector<10x64xf32>
    %22 = vector.extract_strided_slice %12 {offsets = [0, 0], sizes = [32, 32], strides = [1, 1]} : vector<32x224xbf16> to vector<32x32xbf16>
    %23 = vector.extract_strided_slice %12 {offsets = [0, 32], sizes = [32, 32], strides = [1, 1]} : vector<32x224xbf16> to vector<32x32xbf16>
    %24 = vector.extract_strided_slice %12 {offsets = [0, 64], sizes = [32, 32], strides = [1, 1]} : vector<32x224xbf16> to vector<32x32xbf16>
    %25 = vector.extract_strided_slice %12 {offsets = [0, 96], sizes = [32, 64], strides = [1, 1]} : vector<32x224xbf16> to vector<32x64xbf16>
    %26 = vector.extract_strided_slice %12 {offsets = [0, 160], sizes = [32, 64], strides = [1, 1]} : vector<32x224xbf16> to vector<32x64xbf16>
    %27 = vector.extract_strided_slice %15 {offsets = [0, 0], sizes = [64, 32], strides = [1, 1]} : vector<64x96xbf16> to vector<64x32xbf16>
    %28 = vector.extract_strided_slice %15 {offsets = [0, 32], sizes = [64, 32], strides = [1, 1]} : vector<64x96xbf16> to vector<64x32xbf16>
    %29 = vector.extract_strided_slice %15 {offsets = [0, 64], sizes = [64, 32], strides = [1, 1]} : vector<64x96xbf16> to vector<64x32xbf16>
    %30 = vector.extract_strided_slice %21 {offsets = [0, 0], sizes = [1, 64], strides = [1, 1]} : vector<10x64xf32> to vector<1x64xf32>
    %31 = vector.extract_strided_slice %21 {offsets = [1, 0], sizes = [1, 64], strides = [1, 1]} : vector<10x64xf32> to vector<1x64xf32>
    %32 = vector.extract_strided_slice %21 {offsets = [2, 0], sizes = [1, 64], strides = [1, 1]} : vector<10x64xf32> to vector<1x64xf32>
    %33 = vector.extract_strided_slice %21 {offsets = [3, 0], sizes = [1, 64], strides = [1, 1]} : vector<10x64xf32> to vector<1x64xf32>
    %34 = vector.extract_strided_slice %21 {offsets = [4, 0], sizes = [1, 64], strides = [1, 1]} : vector<10x64xf32> to vector<1x64xf32>
    %35 = vector.extract_strided_slice %21 {offsets = [5, 0], sizes = [1, 32], strides = [1, 1]} : vector<10x64xf32> to vector<1x32xf32>
    %36 = vector.extract_strided_slice %21 {offsets = [6, 0], sizes = [1, 32], strides = [1, 1]} : vector<10x64xf32> to vector<1x32xf32>
    %37 = vector.extract_strided_slice %21 {offsets = [7, 0], sizes = [1, 32], strides = [1, 1]} : vector<10x64xf32> to vector<1x32xf32>
    %38 = vector.extract_strided_slice %21 {offsets = [8, 0], sizes = [1, 32], strides = [1, 1]} : vector<10x64xf32> to vector<1x32xf32>
    %39 = vector.extract_strided_slice %21 {offsets = [9, 0], sizes = [1, 32], strides = [1, 1]} : vector<10x64xf32> to vector<1x32xf32>
    %40 = vector.broadcast %35 : vector<1x32xf32> to vector<8x32xf32>
    %41 = arith.mulf %3, %40 : vector<8x32xf32>
    %42 = vector.broadcast %36 : vector<1x32xf32> to vector<8x32xf32>
    %43 = arith.addf %41, %42 : vector<8x32xf32>
    %44 = arith.truncf %43 : vector<8x32xf32> to vector<8x32xbf16>
    %cst = arith.constant dense<0.000000e+00> : vector<8x32xf32>
    %45 = tpu.matmul %44, %22, %cst {dimension_numbers = #tpu.dot_dimension_numbers<[1], [0], [0], [1], [0, 0, 1, 1], [], []>} : vector<8x32xbf16>, vector<32x32xbf16>, vector<8x32xf32> -> vector<8x32xf32>
    %46 = arith.truncf %5 : vector<8x32xf32> to vector<8x32xbf16>
    %cst_19 = arith.constant dense<0.000000e+00> : vector<8x32xf32>
    %47 = tpu.matmul %46, %23, %cst_19 {dimension_numbers = #tpu.dot_dimension_numbers<[1], [0], [0], [1], [0, 0, 1, 1], [], []>} : vector<8x32xbf16>, vector<32x32xbf16>, vector<8x32xf32> -> vector<8x32xf32>
    %48 = arith.truncf %5 : vector<8x32xf32> to vector<8x32xbf16>
    %cst_20 = arith.constant dense<0.000000e+00> : vector<8x32xf32>
    %49 = tpu.matmul %48, %24, %cst_20 {dimension_numbers = #tpu.dot_dimension_numbers<[1], [0], [0], [1], [0, 0, 1, 1], [], []>} : vector<8x32xbf16>, vector<32x32xbf16>, vector<8x32xf32> -> vector<8x32xf32>
    %50 = arith.truncf %7 : vector<8x16xf32> to vector<8x16xbf16>
    %cst_21 = arith.constant dense<0.000000e+00> : vector<8x64xf32>
    %51 = tpu.matmul %50, %18, %cst_21 {dimension_numbers = #tpu.dot_dimension_numbers<[1], [0], [0], [1], [0, 0, 1, 1], [], []>} : vector<8x16xbf16>, vector<16x64xbf16>, vector<8x64xf32> -> vector<8x64xf32>
    %52 = arith.truncf %9 : vector<8x16xf32> to vector<8x16xbf16>
    %cst_22 = arith.constant dense<0.000000e+00> : vector<8x64xf32>
    %53 = tpu.matmul %52, %18, %cst_22 {dimension_numbers = #tpu.dot_dimension_numbers<[1], [0], [0], [1], [0, 0, 1, 1], [], []>} : vector<8x16xbf16>, vector<16x64xbf16>, vector<8x64xf32> -> vector<8x64xf32>
    %54 = vector.shape_cast %51 : vector<8x64xf32> to vector<8x1x64xf32>
    %55 = vector.shape_cast %53 : vector<8x64xf32> to vector<1x8x64xf32>
    %56 = vector.broadcast %54 : vector<8x1x64xf32> to vector<8x8x64xf32>
    %57 = vector.broadcast %55 : vector<1x8x64xf32> to vector<8x8x64xf32>
    %58 = arith.subf %56, %57 : vector<8x8x64xf32>
    %59 = vector.shape_cast %30 : vector<1x64xf32> to vector<1x1x64xf32>
    %60 = vector.broadcast %59 : vector<1x1x64xf32> to vector<8x8x64xf32>
    %61 = arith.mulf %58, %60 : vector<8x8x64xf32>
    %62 = vector.shape_cast %31 : vector<1x64xf32> to vector<1x1x64xf32>
    %63 = vector.broadcast %62 : vector<1x1x64xf32> to vector<8x8x64xf32>
    %64 = arith.addf %61, %63 : vector<8x8x64xf32>
    %cst_23 = arith.constant 5.000000e-01 : f32
    %65 = vector.broadcast %cst_23 : f32 to vector<8x8x64xf32>
    %66 = arith.mulf %65, %64 : vector<8x8x64xf32>
    %cst_24 = arith.constant 4.471500e-02 : f32
    %67 = vector.broadcast %cst_24 : f32 to vector<8x8x64xf32>
    %68 = arith.mulf %67, %64 : vector<8x8x64xf32>
    %69 = arith.mulf %68, %64 : vector<8x8x64xf32>
    %70 = arith.mulf %69, %64 : vector<8x8x64xf32>
    %71 = arith.addf %64, %70 : vector<8x8x64xf32>
    %cst_25 = arith.constant 0.797884583 : f32
    %72 = vector.broadcast %cst_25 : f32 to vector<8x8x64xf32>
    %73 = arith.mulf %72, %71 : vector<8x8x64xf32>
    %74 = math.tanh %73 : vector<8x8x64xf32>
    %cst_26 = arith.constant 1.000000e+00 : f32
    %75 = vector.broadcast %cst_26 : f32 to vector<8x8x64xf32>
    %76 = arith.addf %75, %74 : vector<8x8x64xf32>
    %77 = arith.mulf %66, %76 : vector<8x8x64xf32>
    %78 = vector.shape_cast %77 : vector<8x8x64xf32> to vector<64x64xf32>
    %79 = arith.truncf %78 : vector<64x64xf32> to vector<64x64xbf16>
    %cst_27 = arith.constant dense<0.000000e+00> : vector<64x32xf32>
    %80 = tpu.matmul %79, %27, %cst_27 {dimension_numbers = #tpu.dot_dimension_numbers<[1], [0], [0], [1], [0, 0, 1, 1], [], []>} : vector<64x64xbf16>, vector<64x32xbf16>, vector<64x32xf32> -> vector<64x32xf32>
    %81 = vector.shape_cast %45 : vector<8x32xf32> to vector<8x1x32xf32>
    %82 = vector.shape_cast %47 : vector<8x32xf32> to vector<1x8x32xf32>
    %83 = vector.broadcast %81 : vector<8x1x32xf32> to vector<8x8x32xf32>
    %84 = vector.broadcast %82 : vector<1x8x32xf32> to vector<8x8x32xf32>
    %85 = arith.subf %83, %84 : vector<8x8x32xf32>
    %86 = vector.shape_cast %85 : vector<8x8x32xf32> to vector<64x32xf32>
    %87 = arith.addf %86, %80 : vector<64x32xf32>
    %88 = arith.truncf %87 : vector<64x32xf32> to vector<64x32xbf16>
    %cst_28 = arith.constant dense<0.000000e+00> : vector<64x64xf32>
    %89 = tpu.matmul %88, %25, %cst_28 {dimension_numbers = #tpu.dot_dimension_numbers<[1], [0], [0], [1], [0, 0, 1, 1], [], []>} : vector<64x32xbf16>, vector<32x64xbf16>, vector<64x64xf32> -> vector<64x64xf32>
    %90 = vector.broadcast %32 : vector<1x64xf32> to vector<64x64xf32>
    %91 = arith.mulf %89, %90 : vector<64x64xf32>
    %92 = vector.broadcast %33 : vector<1x64xf32> to vector<64x64xf32>
    %93 = arith.addf %91, %92 : vector<64x64xf32>
    %cst_29 = arith.constant 0.000000e+00 : f32
    %94 = vector.broadcast %cst_29 : f32 to vector<64x64xf32>
    %95 = arith.maximumf %93, %94 : vector<64x64xf32>
    %96 = arith.truncf %95 : vector<64x64xf32> to vector<64x64xbf16>
    %cst_30 = arith.constant dense<0.000000e+00> : vector<64x32xf32>
    %97 = tpu.matmul %96, %28, %cst_30 {dimension_numbers = #tpu.dot_dimension_numbers<[1], [0], [0], [1], [0, 0, 1, 1], [], []>} : vector<64x64xbf16>, vector<64x32xbf16>, vector<64x32xf32> -> vector<64x32xf32>
    %98 = vector.shape_cast %97 : vector<64x32xf32> to vector<8x8x32xf32>
    %99 = vector.shape_cast %80 : vector<64x32xf32> to vector<8x8x32xf32>
    %cst_31 = arith.constant dense<0xFF800000> : vector<8x32xf32>
    %100 = vector.multi_reduction <maximumf>, %98, %cst_31 [1] : vector<8x8x32xf32> to vector<8x32xf32>
    %101 = vector.shape_cast %100 : vector<8x32xf32> to vector<8x1x32xf32>
    %102 = vector.broadcast %101 : vector<8x1x32xf32> to vector<8x8x32xf32>
    %103 = arith.subf %98, %102 : vector<8x8x32xf32>
    %104 = math.exp %103 : vector<8x8x32xf32>
    %cst_32 = arith.constant dense<0.000000e+00> : vector<8x32xf32>
    %105 = vector.multi_reduction <add>, %104, %cst_32 [1] : vector<8x8x32xf32> to vector<8x32xf32>
    %106 = vector.shape_cast %49 : vector<8x32xf32> to vector<1x8x32xf32>
    %107 = vector.broadcast %106 : vector<1x8x32xf32> to vector<8x8x32xf32>
    %108 = arith.addf %107, %99 : vector<8x8x32xf32>
    %109 = arith.mulf %104, %108 : vector<8x8x32xf32>
    %cst_33 = arith.constant dense<0.000000e+00> : vector<8x32xf32>
    %110 = vector.multi_reduction <add>, %109, %cst_33 [1] : vector<8x8x32xf32> to vector<8x32xf32>
    %111 = tpu.reciprocal %105 : vector<8x32xf32> -> vector<8x32xf32>
    %112 = arith.mulf %110, %111 : vector<8x32xf32>
    %113 = arith.addf %3, %112 : vector<8x32xf32>
    %114 = vector.broadcast %37 : vector<1x32xf32> to vector<8x32xf32>
    %115 = arith.mulf %113, %114 : vector<8x32xf32>
    %116 = vector.broadcast %38 : vector<1x32xf32> to vector<8x32xf32>
    %117 = arith.addf %115, %116 : vector<8x32xf32>
    %118 = arith.truncf %117 : vector<8x32xf32> to vector<8x32xbf16>
    %cst_34 = arith.constant dense<0.000000e+00> : vector<8x64xf32>
    %119 = tpu.matmul %118, %26, %cst_34 {dimension_numbers = #tpu.dot_dimension_numbers<[1], [0], [0], [1], [0, 0, 1, 1], [], []>} : vector<8x32xbf16>, vector<32x64xbf16>, vector<8x64xf32> -> vector<8x64xf32>
    %120 = vector.broadcast %34 : vector<1x64xf32> to vector<8x64xf32>
    %121 = arith.addf %119, %120 : vector<8x64xf32>
    %cst_35 = arith.constant 5.000000e-01 : f32
    %122 = vector.broadcast %cst_35 : f32 to vector<8x64xf32>
    %123 = arith.mulf %122, %121 : vector<8x64xf32>
    %cst_36 = arith.constant 4.471500e-02 : f32
    %124 = vector.broadcast %cst_36 : f32 to vector<8x64xf32>
    %125 = arith.mulf %124, %121 : vector<8x64xf32>
    %126 = arith.mulf %125, %121 : vector<8x64xf32>
    %127 = arith.mulf %126, %121 : vector<8x64xf32>
    %128 = arith.addf %121, %127 : vector<8x64xf32>
    %cst_37 = arith.constant 0.797884583 : f32
    %129 = vector.broadcast %cst_37 : f32 to vector<8x64xf32>
    %130 = arith.mulf %129, %128 : vector<8x64xf32>
    %131 = math.tanh %130 : vector<8x64xf32>
    %cst_38 = arith.constant 1.000000e+00 : f32
    %132 = vector.broadcast %cst_38 : f32 to vector<8x64xf32>
    %133 = arith.addf %132, %131 : vector<8x64xf32>
    %134 = arith.mulf %123, %133 : vector<8x64xf32>
    %135 = arith.truncf %134 : vector<8x64xf32> to vector<8x64xbf16>
    %cst_39 = arith.constant dense<0.000000e+00> : vector<8x32xf32>
    %136 = tpu.matmul %135, %29, %cst_39 {dimension_numbers = #tpu.dot_dimension_numbers<[1], [0], [0], [1], [0, 0, 1, 1], [], []>} : vector<8x64xbf16>, vector<64x32xbf16>, vector<8x32xf32> -> vector<8x32xf32>
    %137 = arith.addf %113, %136 : vector<8x32xf32>
    %138 = vector.broadcast %39 : vector<1x32xf32> to vector<8x32xf32>
    %139 = arith.addf %137, %138 : vector<8x32xf32>
    %c0_40 = arith.constant 0 : index
    %c0_41 = arith.constant 0 : index
    %140 = vector.load %arg11[%c0_40, %c0_41] : memref<8x32xf32, #tpu.memory_space<vmem>>, vector<8x32xf32>
    tpu.vector_store %arg11[%c0_40, %c0_41], %139 {strides = array<i32>} : memref<8x32xf32, #tpu.memory_space<vmem>>, vector<8x32xf32>,
    %c0_42 = arith.constant 0 : index
    %c0_43 = arith.constant 0 : index
    %c0_44 = arith.constant 0 : index
    %141 = vector.load %arg10[%c0_42, %c0_43, %c0_44] : memref<1x8x32xf32, #tpu.memory_space<vmem>>, vector<1x8x32xf32>
    %142 = vector.shape_cast %141 : vector<1x8x32xf32> to vector<8x32xf32>
    %143 = vector.shape_cast %139 : vector<8x32xf32> to vector<1x8x32xf32>
    tpu.vector_store %arg10[%c0_42, %c0_43, %c0_44], %143 {strides = array<i32>} : memref<1x8x32xf32, #tpu.memory_space<vmem>>, vector<1x8x32xf32>,
    return
  }
  func.func @transform_0(%arg0: i32, %arg1: i32) -> (i32, i32, i32) {
    %c0_i32 = arith.constant 0 : i32
    %c0_i32_0 = arith.constant 0 : i32
    %c0_i32_1 = arith.constant 0 : i32
    return %arg0, %c0_i32, %c0_i32_0 : i32, i32, i32
  }
  func.func @transform_1(%arg0: i32, %arg1: i32) -> (i32, i32, i32) {
    %c0_i32 = arith.constant 0 : i32
    %c0_i32_0 = arith.constant 0 : i32
    %c0_i32_1 = arith.constant 0 : i32
    return %arg0, %c0_i32, %c0_i32_0 : i32, i32, i32
  }
  func.func @transform_2(%arg0: i32, %arg1: i32) -> (i32, i32, i32) {
    %c0_i32 = arith.constant 0 : i32
    %c0_i32_0 = arith.constant 0 : i32
    %c0_i32_1 = arith.constant 0 : i32
    return %arg0, %c0_i32, %c0_i32_0 : i32, i32, i32
  }
  func.func @transform_3(%arg0: i32, %arg1: i32) -> (i32, i32, i32) {
    %c0_i32 = arith.constant 0 : i32
    %c0_i32_0 = arith.constant 0 : i32
    %c0_i32_1 = arith.constant 0 : i32
    return %arg0, %c0_i32, %c0_i32_0 : i32, i32, i32
  }
  func.func @transform_4(%arg0: i32, %arg1: i32) -> (i32, i32, i32) {
    %c0_i32 = arith.constant 0 : i32
    %c0_i32_0 = arith.constant 0 : i32
    %c0_i32_1 = arith.constant 0 : i32
    %c0_i32_2 = arith.constant 0 : i32
    return %c0_i32, %c0_i32_0, %c0_i32_1 : i32, i32, i32
  }
  func.func @transform_5(%arg0: i32, %arg1: i32) -> (i32, i32, i32) {
    %c0_i32 = arith.constant 0 : i32
    %c0_i32_0 = arith.constant 0 : i32
    %c0_i32_1 = arith.constant 0 : i32
    %c0_i32_2 = arith.constant 0 : i32
    return %c0_i32, %c0_i32_0, %c0_i32_1 : i32, i32, i32
  }
  func.func @transform_6(%arg0: i32, %arg1: i32) -> (i32, i32, i32) {
    %c0_i32 = arith.constant 0 : i32
    %c0_i32_0 = arith.constant 0 : i32
    %c0_i32_1 = arith.constant 0 : i32
    %c0_i32_2 = arith.constant 0 : i32
    return %c0_i32, %c0_i32_0, %c0_i32_1 : i32, i32, i32
  }
  func.func @transform_7(%arg0: i32, %arg1: i32) -> (i32, i32, i32) {
    %c0_i32 = arith.constant 0 : i32
    %c0_i32_0 = arith.constant 0 : i32
    %c0_i32_1 = arith.constant 0 : i32
    %c0_i32_2 = arith.constant 0 : i32
    return %c0_i32, %c0_i32_0, %c0_i32_1 : i32, i32, i32
  }
  func.func @transform_8(%arg0: i32, %arg1: i32) -> (i32, i32, i32) {
    %c0_i32 = arith.constant 0 : i32
    %c0_i32_0 = arith.constant 0 : i32
    %c0_i32_1 = arith.constant 0 : i32
    return %arg0, %c0_i32, %c0_i32_0 : i32, i32, i32
  }
}

</mosaic_0001>

<bundles_post_ra>
// kernel: tpu_custom_call.1
= control target key start
LH: loop header
LB: loop body
LE: loop exit
PB: predicated region body
PF: predicated region fallthrough
CT: control target
= control target key end

     0   :  { %s2631_s0 = inlined_call_operand.vmem [shape: f32[2,8,32], index: 0, kind: input, shape index: {}]   ;;  %s2632_s1 = inlined_call_operand.vmem [shape: f32[2,8,32], index: 1, kind: input, shape index: {}]   ;;  %s2633_s2 = inlined_call_operand.vmem [shape: f32[2,8,16], index: 2, kind: input, shape index: {}]   ;;  %s2634_s3 = inlined_call_operand.hbm [shape: f32[2,8,16], index: 3, kind: input, shape index: {}]   ;;  %s2635_s4 = inlined_call_operand.hbm [shape: bf16[2,32,224], index: 4, kind: input, shape index: {}]   ;;  %s2636_s5 = inlined_call_operand.hbm [shape: bf16[2,64,96], index: 5, kind: input, shape index: {}]   ;;  %s2637_s6 = inlined_call_operand.hbm [shape: bf16[2,16,64], index: 6, kind: input, shape index: {}]   ;;  %s2638_s7 = inlined_call_operand.vmem [shape: f32[2,10,64], index: 7, kind: input, shape index: {}]   ;;  %s2639_s8 = inlined_call_operand.hbm [shape: f32[2,8,32], index: 8, kind: output, shape index: {}]  }
   0x1   :  { %2644 = sst [smem:[#allocation20_spill]] %s2635_s4 }
   0x2   :  { %2645 = sst [smem:[#allocation21_spill]] %s2636_s5 }
   0x3   :  { %2646 = sst [smem:[#allocation22_spill]] %s2637_s6 }
   0x4   :  { %13 = vsyncpa [#allocation4], 0 }
   0x5   :  { %15 = vsyncpa [#allocation4 + $0x1], 0 }
   0x6   :  { %16 = vsyncpa [#allocation7], 0 }
   0x7   :  { %17 = vsyncpa [#allocation10], 0 }
   0x8   :  { %18 = vsyncpa [#allocation5], 0 }
   0x9   :  { %20 = vsyncpa [#allocation5 + $0x1], 0  ;;  %s2110_s27 = smov 0   ;;  %s2112_s28 = smov 0  }
   0xa   :  { %s2114_s29 = smov 0   ;;  %s2116_s30 = smov 0  }
   0xb   :  { %s2118_s9 = smov 0   ;;  %s2120_s10 = smov 0  }
   0xc   :  { %s2122_s11 = smov 0   ;;  %s2124_s12 = smov 0  }
   0xd LB: > { %2647 = sst [smem:[#allocation16_spill]] %s2025_s27  ;;  %s2640_s13 = sadd.s32 4294967295, %s2053_s12   ;;  %s2053_s12 = sphi %s2124_s12, %s26_s12   ;;  %s2049_s11 = sphi %s2122_s11, %s2676_s11   ;;  %s2045_s10 = sphi %s2120_s10, %s2671_s10   ;;  %s2041_s9 = sphi %s2118_s9, %s2675_s9   ;;  %s2037_s30 = sphi %s2116_s30, %s2670_s30   ;;  %s2033_s29 = sphi %s2114_s29, %s2674_s29   ;;  %s2029_s28 = sphi %s2112_s28, %s2673_s28   ;;  %s2025_s27 = sphi %s2110_s27, %s2672_s27  }
   0xe   : > { %2648 = sst [smem:[#allocation17_spill]] %s2045_s10  ;;  %p1565_p0 = scmp.ge.s32.totalorder %s2053_s12, 1 }
   0xf   : > { %p2154_p1 = scmp.eq.s32.totalorder %s2640_s13, 0  ;;  %p257_p2 = scmp.lt.s32.totalorder %s2053_s12, 5 }
  0x10   : > { %s2650_s4 = sld [smem:[#allocation20_spill]]  ;;  %s2055_s19 = smov [#allocation6]  }
  0x11   : > { %p2162_p3 = pnand %p1565_p0, %p257_p2  ;;  %s270_s20 = sshll.u32 %s2055_s19, 4  ;;  %s271_s20 = int_to_ptr.vmem [resolvable:$true] %s270_s20 }
  0x12   : > { %s2653_s5 = sld [smem:[#allocation21_spill]]  ;;  %s2056_s25 = smov 128  }
  0x13   : > { %p1675_p4 = pneg %p2162_p3  ;;  %s2057_s26 = smov 8  }
  0x14   : > { %s2058_s15 = smov [#allocation8]   ;;  %s2059_s19 = smov 64  }
  0x15   : > { %p2170_p5 = pnand %p1675_p4, %p2154_p1  ;;  %s284_s16 = sshll.u32 %s2058_s15, 4  ;;  %s285_s16 = int_to_ptr.vmem [resolvable:$true] %s284_s16 }
  0x16   : > { %s268_s17 = sshll.u32 %s2650_s4, 4  ;;  %s2060_s22 = smov 4   ;;  %s269_s17 = int_to_ptr.hbm [resolvable:$true] %s268_s17 }
  0x17   : > { %1678 = dma.hbm_to_vmem [thread:$0]  (!%p2170_p5), %s269_s17, 1024, %s271_s20, [#allocation7], %s2056_s25, %s2056_s25, %s2057_s26  }
  0x18   : > { %s282_s24 = sshll.u32 %s2653_s5, 4  ;;  %s2654_s6 = sld [smem:[#allocation22_spill]]  ;;  %s283_s24 = int_to_ptr.hbm [resolvable:$true] %s282_s24 }
  0x19   : > { %1681 = dma.hbm_to_vmem [thread:$0]  (!%p2170_p5), %s283_s24, 1024, %s285_s16, [#allocation7], %s2059_s19, %s2059_s19, %s2060_s22  }
  0x1a   : > { %s2061_s17 = smov [#allocation9]   ;;  %s1564_s25 = sadd.s32 4294967294, %s2053_s12  }
  0x1b   : > { %s298_s20 = sshll.u32 %s2061_s17, 4  ;;  %s35_s26 = sadd.s32 1, %s2045_s10  ;;  %s299_s20 = int_to_ptr.vmem [resolvable:$true] %s298_s20 }
  0x1c   : > { %s38_s15 = sadd.s32 1, %s2049_s11  ;;  %p36_p6 = scmp.ge.s32.totalorder %s35_s26, 2 }
  0x1d   : > { %s123_s24 = sadd.s32 1, %s2033_s29  ;;  %p130_p7 = scmp.ne.s32.totalorder %s2033_s29, %s2029_s28 }
  0x1e   : > { %s296_s4 = sshll.u32 %s2654_s6, 4  ;;  %p131_p8 = scmp.eq.s32.totalorder %s2053_s12, 0  ;;  %s297_s4 = int_to_ptr.hbm [resolvable:$true] %s296_s4 }
  0x1f   : > { %1684 = dma.hbm_to_vmem [thread:$0]  (!%p2170_p5), %s297_s4, 256, %s299_s20, [#allocation10], %s2059_s19, %s2059_s19, %s2060_s22  }
  0x20   : > { %s2678_s26 = smov (%p36_p6, %s35_s26), 0  ;;  %s2680_s15 = smov (!%p36_p6, %s38_s15), %s2049_s11 }
  0x21   : > { %2655 = sst [smem:[#allocation18_spill]] %s2678_s26  ;;  %p2196_p9 = por %p131_p8, %p130_p7 }
  0x22   : > { %p136_p10 = scmp.ne.s32.totalorder %s2029_s28, %s2025_s27  ;;  %p40_p11 = scmp.ge.s32.totalorder %s2680_s15, 2 }
  0x23   : > { %s2657_s4 = sadd.s32 4294967295, %s2053_s12   ;;  %p250_p0 = scmp.eq.s32.totalorder %s1564_s25, 3 }
  0x24   : > { %p244_p12 = scmp.eq.s32.totalorder %s2657_s4, 3  ;;  %p2206_p13 = por %p2154_p1, %p136_p10 }
  0x25   : > { %s2682_s15 = smov (%p40_p11, %s2680_s15), 0  ;;  %p2216_p4 = por %p250_p0, %p136_p10 }
  0x26   : > { %p2212_p2 = por %p244_p12, %p130_p7  ;;  %s120_s22 = ssub.s32 %s2049_s11, %s2682_s15 }
  0x27   : > { %s2660_s19 = scalar_select %p2216_p4, 1, 0 }
  0x28   : > { %p1696_p5 = scmp.lt.s32.totalorder %s2053_s12, 4  ;;  %p121_p6 = scmp.eq.s32.totalorder %s120_s22, 0 }
  0x29   : > { %2661 = sst [smem:[#allocation19_spill]] %s2660_s19  ;;  %s336_s23 = sand.u32 1, %s2033_s29  }
  0x2a   : > { %s1570_s17 = sshll.u32 %s336_s23, 3  ;;  %s1571_s25 = sshll.u32 %s2049_s11, 3 }
  0x2b   : > { %s2225_s20 = scalar_select %p121_p6, %s2033_s29, %s123_s24  }
  0x2c   : > { %s344_s6 = scalar_lea.hbm %s2634_s3, %s1571_s25  ;;  %s340_s26 = scalar_lea.vmem [#allocation3], %s1570_s17 }
  0x2d   : > { %s348_s10 = sshll.u32 %s340_s26, 4  ;;  %s346_s27 = sshll.u32 %s344_s6, 4  ;;  %s349_s10 = int_to_ptr.vmem [resolvable:$true] %s348_s10  ;;  %s347_s27 = int_to_ptr.hbm [resolvable:$true] %s346_s27 }
  0x2e   : > { %p1686_p7 = pnand %p1696_p5, %p2196_p9  ;;  %s337_s19 = scalar_lea.sflag [#allocation4], %s336_s23 }
  0x2f   : > { %357 = sbr.rel (%p2162_p3) target bundleno = 1087 (0x43f), region = 52  ;;  %s2236_s24 = sand.u32 (!%p2162_p3), 1, %s2029_s28  }
  0x30   : > { %1688 = dma.hbm_to_vmem [thread:$0]  (!%p1686_p7), %s347_s27, 128, %s349_s10, %s337_s19  }
  0x31   : > { %s1573_s5 = sshll.u32 (!%p2162_p3), %s2236_s24, 3  ;;  %s360_s22 = scalar_lea.sflag (!%p2162_p3), [#allocation4], %s2236_s24 }
  0x32   : > { %s2240_s17 = scalar_lea.vmem (!%p2162_p3), [#allocation3], %s1573_s5 }
  0x34   : > { %2008 = dma.done.wait (%p2206_p13), %s360_s22, 128  }
  0x35   : > { %2010 = vsyncadd (%p2206_p13), %s360_s22, 4294967168 }
  0x36   : > { %2012 = dma.done.wait (%p2154_p1), [#allocation7], 2048  }
  0x37   : > { %2014 = vsyncadd (%p2154_p1), [#allocation7], 4294965248 }
  0x38   : > { %2016 = dma.done.wait (%p2154_p1), [#allocation10], 256  }
  0x39   : > { %2018 = vsyncadd (%p2154_p1), [#allocation10], 4294967040  ;;  %p424_p3 = scmp.lt.s32.totalorder %s2041_s9, 1  ;;  %s2270_s4 = scalar_lea.vmem [#allocation11], %s1573_s5 }
  0x3a   : > { %p1581_p1 = scmp.ne.s32.totalorder %s2037_s30, 0 }
  0x3b   : > { %s425_s6 = scalar_select %p424_p3, %s2041_s9, 1 }
  0x3c   : > { %440 = sbr.rel (%p1581_p1) target bundleno = 67 (0x43), region = 72 }
  0x3d   : > { %s2256_s27 = sshll.u32 %s425_s6, 3 }
  0x3e   : > { %s427_s26 = scalar_lea.vmem %s2631_s0, %s2256_s27  ;;  %s431_s19 = scalar_lea.vmem %s2632_s1, %s2256_s27 }
  0x3f   : > { %s435_s25 = scalar_lea.vmem %s2633_s2, %s2256_s27 }
  0x41   : > { %v441_v0 = vld [vmem:[%s427_s26] sm:$0xff]  ;;  %vm442_vm0 = vcmask 261120  }
  0x42   : > { %443 = vst.msk [vmem:[#allocation2] sm:$0xff] %vm442_vm0, %v441_v0 }
  0x43 PF: > { %s1657_s22 = sshll.u32 %s2037_s30, 3  ;;  %v446_v1 = vld [vmem:[%s435_s25] sm:$0xff]  ;;  %s1647_s6 = sshll.u32 %s2037_s30, 5  ;;  %vm557_vm1 = vcmask 130048   ;;  %v447_v13 = vld [vmem:[%s2240_s17] sm:$0xff]  ;;  %vm491_vm2 = vcmask 261120  }
  0x44   : > { %s467_s10 = scalar_lea.vmem [#allocation9], %s1657_s22  ;;  %s2277_s18 = scalar_lea.vmem [#allocation6], %s1647_s6  ;;  %v550_v5 = vpack.c.bf16 %v446_v1, %v446_v1  ;;  %v574_v14 = vpack.c.bf16 %v447_v13, %v447_v13  ;;  %v445_v26 = vld [vmem:[%s431_s19] sm:$0xff]  ;;  %vm741_vm3 = vcmask 523264   ;;  %vm1306_vm8 = vcmask 1041409  }
  0x45   : > { %v1658_v2 = vld [vmem:[%s467_s10] sm:$0xff]  ;;  %v1594_v3 = vld [vmem:[%s2277_s18 + $0x10] sm:$0xf]  ;;  %v1651_v4 = vld [vmem:[%s2277_s18 + $0x14] sm:$0xf0]  ;;  %s2062_s5 = smov 96   ;;  %v508_v28 = vpack.c.bf16 %v445_v26, %v445_v26 }
  0x46   : > { %v1595_v6 = vor.u32 %v1651_v4, %v1594_v3  ;;  %v1590_v7 = vld [vmem:[%s2277_s18] sm:$0xf]  ;;  %v1649_v8 = vld [vmem:[%s2277_s18 + $0x4] sm:$0xf0]  ;;  %568 = vmatpush.bf16.msra.mxu3 %v1658_v2  ;;  %s2063_s26 = smov 32   ;;  %s2064_s13 = smov 64  }
  0x47   : > { %v1591_v9 = vor.u32 %v1649_v8, %v1590_v7  ;;  %v1650_v10 = vld [vmem:[%s2277_s18 + $0x14] sm:$0xf]  ;;  %v1629_v11 = vld [vmem:[%s2277_s18 + $0x18] sm:$0xf0]  ;;  %s1587_s21 = sshll.u32 %s2037_s30, 4  ;;  %s456_s17 = scalar_lea.vmem [#allocation8], %s1647_s6 }
  0x48   : > { %511 = vrot.lane.b32.xlu0 %v1595_v6, %s2062_s5  ;;  %837 = vrot.lane.b32.xlu1 %v1595_v6, %s2063_s26  ;;  %v1632_v12 = vor.u32 %v1650_v10, %v1629_v11  ;;  %s2299_s25 = scalar_lea.vmem %s2638_s7, %s1587_s21  ;;  %v2311_v25 = vld [vmem:[%s456_s17 + $0x18] sm:$0xff]  ;;  %v1655_v27 = vld [vmem:[%s456_s17 + $0x10] sm:$0xff]  ;;  %s1644_s30 = sshll.u32 %s2041_s9, 3 }
  0x49   : > { %501 = vmatpush.bf16.msra.mxu0 %v1595_v6  ;;  %1603 = vmatmul.msk.bf16.vlgmr.msra.gmra.mxu3 %vm557_vm1, %v550_v5  ;;  %v2302_v15 = vld [vmem:[%s2299_s25] sm:$0xff]  ;;  %v2318_v29 = vld [vmem:[%s456_s17 + $0x8] sm:$0xff]  ;;  %s1404_s6 = scalar_lea.hbm %s2639_s8, %s1644_s30  ;;  %s1967_s14 = scalar_lea.hbm %s2639_s8, 16 }
  0x4a   : > { %585 = vmatpush.bf16.msrb.mxu3 %v1658_v2  ;;  %833 = vrot.lane.b32.xlu2 %v1591_v9, %s2063_s26  ;;  %v474_v17 = vperm.slane %v2302_v15, 5  ;;  %v444_v18 = vld [vmem:[#allocation2] sm:$0xff]  ;;  %v476_v20 = vperm.slane %v2302_v15, 6  ;;  %v2340_v39 = vperm.slane %v2302_v15, 0  ;;  %v2346_v45 = vperm.slane %v2302_v15, 1 }
  0x4b   : > { %v2330_v33 = vld [vmem:[%s456_s17] sm:$0xff] }
  0x4c   : > { %v475_v19 = vmul.f32 %v474_v17, %v444_v18  ;;  %v1648_v18 = vld [vmem:[%s2277_s18 + $0x4] sm:$0xf] }
  0x4d   : > { %502 = vmatpush.bf16.msra.mxu0 %v1591_v9 }
  0x4e   : > { %v477_v21 = vadd.f32 %v476_v20, %v475_v19 }
  0x50   : > { %509 = vrot.lane.b32.xlu0 %v1591_v9, %s2062_s5  ;;  %839 = vrot.lane.b32.xlu1 %v1632_v12, %s2063_s26  ;;  %v478_v23 = vpack.c.bf16 %v477_v21, %v477_v21  ;;  %v1625_v21 = vld [vmem:[%s2277_s18 + $0x8] sm:$0xf0]  ;;  %s1406_s18 = sshll.u32 %s2270_s4, 4  ;;  %s1407_s18 = int_to_ptr.vmem [resolvable:$true] %s1406_s18 }
  0x51   : > { %758 = vmatpush.bf16.msrb.mxu0 %v2311_v25 }
  0x52   : > { %1596 = vmatmul.msk.bf16.vlgmr.msra.gmra.mxu0 %vm491_vm2, %v478_v23  ;;  %v1628_v23 = vor.u32 %v1648_v18, %v1625_v21 }
  0x54   : > { %835 = vrot.lane.b32.xlu2 %v1628_v23, %s2063_s26  ;;  %s1394_s26 = scalar_lea.sflag [#allocation5], %s2236_s24 }
  0x55   : > { %759 = vmatpush.bf16.msrb.mxu0 %v1655_v27 }
  0x58   : > { %533 = vrot.lane.b32.xlu0 %v1595_v6, %s2064_s13  ;;  %531 = vrot.lane.b32.xlu1 %v1591_v9, %s2064_s13 }
  0x59   : > { %1604 = vmatmul.msk.bf16.vlgmr.msrb.gmra.mxu3 %vm557_vm1, %v574_v14  ;;  %760 = vmatpush.bf16.msrb.mxu0 %v2318_v29  ;;  %vm1308_vm1 = vcmask 1042434  }
  0x5c   : > { %923 = vrot.lane.b32.xlu2 %v2311_v25, %s2062_s5 }
  0x5d   : > { %761 = vmatpush.bf16.msrb.mxu0 %v2330_v33 }
  0x60   : > { %921 = vrot.lane.b32.xlu0 %v1655_v27, %s2062_s5  ;;  %919 = vrot.lane.b32.xlu1 %v2318_v29, %s2062_s5 }
  0x64   : > { %917 = vrot.lane.b32.xlu2 %v2330_v33, %s2062_s5 }
  0x68   : > { %1330 = vrot.lane.b32.xlu0 %v1632_v12, %s2062_s5  ;;  %1328 = vrot.lane.b32.xlu1 %v1628_v23, %s2062_s5  ;;  %s1408_s5 = sshll.u32 %s1404_s6, 4  ;;  %s1409_s5 = int_to_ptr.hbm [resolvable:$true] %s1408_s5 }
  0x6c   : > { %1366 = vrot.lane.b32.xlu2 %v2311_v25, %s2064_s13 }
  0x70   : > { %1364 = vrot.lane.b32.xlu0 %v1655_v27, %s2064_s13  ;;  %1362 = vrot.lane.b32.xlu1 %v2318_v29, %s2064_s13 }
  0x74   : > { %1360 = vrot.lane.b32.xlu2 %v2330_v33, %s2064_s13  ;;  %s1961_s13 = sshra.s32 %s1409_s5, 4  ;;  %s1962_s13 = int_to_ptr.hbm [resolvable:$true] %s1961_s13 }
  0x75   : > { %s1963_s9 = scalar_lea.hbm %s1962_s13, 8  ;;  %p1968_p11 = scmp.lt.s32.totalorder %s1962_s13, %s2639_s8 }
  0x76   : > { %p1964_p8 = scmp.ne.s32.totalorder %s1962_s13, %s1963_s9  ;;  %p1969_p12 = scmp.lt.s32.totalorder %s1967_s14, %s1963_s9 }
  0x78   : > { %p1965_p9 = pnand %p1964_p8, %p2212_p2  ;;  %p1970_p13 = por %p1969_p12, %p1968_p11 }
  0x7a   : > { %p1966_p10 = pneg %p1965_p9 }
  0x7c   : > { %p1971_p0 = pnand %p1970_p13, %p1966_p10 }
  0xba   : > { %v512_v16 = vpop.permute.xlu0 %511  ;;  %v2306_v22 = vpop.permute.xlu1 %837 }
  0xbb   : > { %524 = vmatpush.bf16.msra.mxu1 %v512_v16 }
  0xc2   : > { %v510_v24 = vpop.permute.xlu0 %509  ;;  %v2325_v30 = vpop.permute.xlu1 %839 }
  0xc3   : > { %525 = vmatpush.bf16.msra.mxu1 %v510_v24 }
  0xc6   : > { %1597 = vmatmul.msk.bf16.vlgmr.msra.gmra.mxu1 %vm491_vm2, %v508_v28 }
  0xca   : > { %v534_v31 = vpop.permute.xlu0 %533  ;;  %v532_v34 = vpop.permute.xlu1 %531 }
  0xcb   : > { %543 = vmatpush.bf16.msra.mxu2 %v534_v31 }
  0xcc   : > { %v2327_v32 = vpop.f32.mrf.mxu3 }
  0xcd   : > { %v592_v36 = vrot.slane %v2327_v32, 1  ;;  %v593_v37 = vrot.slane %v2327_v32, 2  ;;  %v594_v38 = vrot.slane %v2327_v32, 3  ;;  %v599_v40 = vperm.slane %v2327_v32, 0 }
  0xce   : > { %v595_v54 = vrot.slane %v2327_v32, 4  ;;  %v596_v59 = vrot.slane %v2327_v32, 5  ;;  %v597_v31 = vrot.slane %v2327_v32, 6 }
  0xcf   : > { %544 = vmatpush.bf16.msra.mxu2 %v532_v34  ;;  %v600_v41 = vperm.slane %v592_v36, 0  ;;  %v601_v42 = vperm.slane %v593_v37, 0  ;;  %v602_v43 = vperm.slane %v594_v38, 0  ;;  %v598_v34 = vrot.slane %v2327_v32, 7 }
  0xd0   : > { %v603_v1 = vperm.slane %v595_v54, 0  ;;  %v604_v4 = vperm.slane %v596_v59, 0 }
  0xd2   : > { %1598 = vmatmul.msk.bf16.vlgmr.msra.gmra.mxu2 %vm491_vm2, %v508_v28 }
  0xd4   : > { %v572_v35 = vpop.f32.mrf.mxu3 }
  0xdc   : > { %v2343_v44 = vpop.f32.mrf.mxu3 }
  0xdd   : > { %v615_v46 = vsub.f32 %v599_v40, %v2343_v44  ;;  %v616_v47 = vsub.f32 %v600_v41, %v2343_v44  ;;  %v617_v48 = vsub.f32 %v601_v42, %v2343_v44  ;;  %v618_v49 = vsub.f32 %v602_v43, %v2343_v44 }
  0xde   : > { %v619_v5 = vsub.f32 %v603_v1, %v2343_v44  ;;  %v620_v9 = vsub.f32 %v604_v4, %v2343_v44 }
  0xdf   : > { %v624_v50 = vmul.f32 %v2340_v39, %v615_v46  ;;  %v625_v51 = vmul.f32 %v2340_v39, %v616_v47  ;;  %v626_v52 = vmul.f32 %v2340_v39, %v617_v48  ;;  %v627_v53 = vmul.f32 %v2340_v39, %v618_v49 }
  0xe0   : > { %v628_v13 = vmul.f32 %v2340_v39, %v619_v5  ;;  %v629_v19 = vmul.f32 %v2340_v39, %v620_v9  ;;  %v605_v46 = vperm.slane %v597_v31, 0  ;;  %v606_v49 = vperm.slane %v598_v34, 0 }
  0xe1   : > { %v633_v55 = vadd.f32 %v2346_v45, %v624_v50  ;;  %v634_v56 = vadd.f32 %v2346_v45, %v625_v51  ;;  %v2360_v57 = vadd.f32 %v2346_v45, %v626_v52  ;;  %v2363_v58 = vadd.f32 %v2346_v45, %v627_v53 }
  0xe2   : > { %v2381_v26 = vadd.f32 %v2346_v45, %v628_v13  ;;  %v2386_v28 = vadd.f32 %v2346_v45, %v629_v19  ;;  %v621_v51 = vsub.f32 %v605_v46, %v2343_v44  ;;  %v622_v53 = vsub.f32 %v606_v49, %v2343_v44 }
  0xe3   : > { %v649_v60 = vmul.f32 0.044715, %v633_v55  ;;  %v650_v61 = vmul.f32 0.044715, %v634_v56  ;;  %v651_v63 = vmul.f32 0.044715, %v2360_v57 }
  0xe4   : > { %v589_v62 = vpop.f32.mrf.mxu3  ;;  %v652_v0 = vmul.f32 0.044715, %v2363_v58  ;;  %v653_v37 = vmul.f32 0.044715, %v2381_v26  ;;  %v641_v40 = vmul.f32 0.5, %v633_v55  ;;  %v642_v47 = vmul.f32 0.5, %v634_v56 }
  0xe5   : > { %v657_v2 = vmul.f32 %v649_v60, %v633_v55  ;;  %v658_v3 = vmul.f32 %v650_v61, %v634_v56  ;;  %v659_v8 = vmul.f32 %v651_v63, %v2360_v57  ;;  %v654_v43 = vmul.f32 0.044715, %v2386_v28 }
  0xe6   : > { %v660_v10 = vmul.f32 %v652_v0, %v2363_v58  ;;  %v661_v32 = vmul.f32 %v653_v37, %v2381_v26  ;;  %v631_v60 = vmul.f32 %v2340_v39, %v622_v53  ;;  %v643_v4 = vmul.f32 0.5, %v2360_v57 }
  0xe7   : > { %v665_v6 = vmul.f32 %v657_v2, %v633_v55  ;;  %v666_v7 = vmul.f32 %v658_v3, %v634_v56  ;;  %v667_v17 = vmul.f32 %v659_v8, %v2360_v57  ;;  %v662_v54 = vmul.f32 %v654_v43, %v2386_v28  ;;  %v504_v43 = vpop.f32.mrf.mxu0 }
  0xe8   : > { %v668_v20 = vmul.f32 %v660_v10, %v2363_v58  ;;  %v669_v59 = vmul.f32 %v661_v32, %v2381_v26  ;;  %v640_v1 = vadd.f32 %v2346_v45, %v631_v60  ;;  %v646_v25 = vmul.f32 0.5, %v2386_v28 }
  0xe9   : > { %v673_v11 = vadd.f32 %v665_v6, %v633_v55  ;;  %v674_v12 = vadd.f32 %v666_v7, %v634_v56  ;;  %v675_v24 = vadd.f32 %v667_v17, %v2360_v57  ;;  %v630_v56 = vmul.f32 %v2340_v39, %v621_v51 }
  0xea   : > { %v676_v27 = vadd.f32 %v668_v20, %v2363_v58  ;;  %v670_v61 = vmul.f32 %v662_v54, %v2386_v28  ;;  %v677_v29 = vadd.f32 %v669_v59, %v2381_v26  ;;  %v644_v39 = vmul.f32 0.5, %v2363_v58 }
  0xeb   : > { %v681_v14 = vmul.f32 0.7978846, %v673_v11  ;;  %v682_v16 = vmul.f32 0.7978846, %v674_v12  ;;  %v683_v36 = vmul.f32 0.7978846, %v675_v24  ;;  %v639_v44 = vadd.f32 %v2346_v45, %v630_v56 }
  0xec   : > { %v684_v42 = vmul.f32 0.7978846, %v676_v27  ;;  %v678_v0 = vadd.f32 %v670_v61, %v2386_v28  ;;  %v685_v5 = vmul.f32 0.7978846, %v677_v29  ;;  %v656_v8 = vmul.f32 0.044715, %v640_v1 }
  0xed   : > { %1775 = vtanh.f32 %v681_v14  ;;  %v655_v6 = vmul.f32 0.044715, %v639_v44  ;;  %v645_v20 = vmul.f32 0.5, %v2381_v26  ;;  %v647_v37 = vmul.f32 0.5, %v639_v44 }
  0xee   : > { %1777 = vtanh.f32 %v682_v16  ;;  %v686_v7 = vmul.f32 0.7978846, %v678_v0  ;;  %v664_v12 = vmul.f32 %v656_v8, %v640_v1  ;;  %v843_v26 = vsel %vm491_vm2, %v2306_v22, %v2325_v30 }
  0xef   : > { %1779 = vtanh.f32 %v683_v36  ;;  %v663_v11 = vmul.f32 %v655_v6, %v639_v44  ;;  %864 = vmatpush.bf16.msrb.mxu1 %v843_v26  ;;  %v785_v51 = vrot.slane %v504_v43, 2  ;;  %v787_v32 = vrot.slane %v504_v43, 4 }
  0xf0   : > { %1781 = vtanh.f32 %v684_v42  ;;  %v672_v57 = vmul.f32 %v664_v12, %v640_v1  ;;  %v834_v42 = vpop.permute.xlu2 %833  ;;  %v788_v53 = vrot.slane %v504_v43, 5  ;;  %v789_v54 = vrot.slane %v504_v43, 6 }
  0xf1   : > { %1783 = vtanh.f32 %v685_v5  ;;  %v671_v13 = vmul.f32 %v663_v11, %v639_v44  ;;  %v793_v22 = vperm.slane %v785_v51, 0  ;;  %v795_v56 = vperm.slane %v787_v32, 0 }
  0xf2   : > { %1785 = vtanh.f32 %v686_v7  ;;  %v680_v17 = vadd.f32 %v672_v57, %v640_v1  ;;  %v796_v59 = vperm.slane %v788_v53, 0  ;;  %v797_v60 = vperm.slane %v789_v54, 0 }
  0xf3   : > { %v1776_v35 = vpop.eup %1775  ;;  %v679_v16 = vadd.f32 %v671_v13, %v639_v44  ;;  %v791_v5 = vperm.slane %v504_v43, 0 }
  0xf4   : > { %v1778_v38 = vpop.eup %1777  ;;  %v697_v41 = vadd.f32 1.0, %v1776_v35  ;;  %v688_v23 = vmul.f32 0.7978846, %v680_v17 }
  0xf5   : > { %v698_v48 = vadd.f32 1.0, %v1778_v38  ;;  %v1780_v62 = vpop.eup %1779  ;;  %v687_v21 = vmul.f32 0.7978846, %v679_v16  ;;  %v648_v38 = vmul.f32 0.5, %v640_v1 }
  0xf6   : > { %v705_v50 = vmul.f32 %v697_v41, %v641_v40  ;;  %v1782_v63 = vpop.eup %1781  ;;  %v699_v2 = vadd.f32 1.0, %v1780_v62 }
  0xf7   : > { %v706_v52 = vmul.f32 %v698_v48, %v642_v47  ;;  %v700_v3 = vadd.f32 1.0, %v1782_v63  ;;  %v1784_v14 = vpop.eup %1783  ;;  %1787 = vtanh.f32 %v687_v21  ;;  %v506_v47 = vpop.f32.mrf.mxu0 }
  0xf8   : > { %v707_v9 = vmul.f32 %v699_v2, %v643_v4  ;;  %v1786_v58 = vpop.eup %1785  ;;  %v701_v18 = vadd.f32 1.0, %v1784_v14  ;;  %1789 = vtanh.f32 %v688_v23  ;;  %v836_v48 = vpop.permute.xlu2 %835  ;;  %v784_v4 = vrot.slane %v504_v43, 1 }
  0xf9   : > { %v713_v55 = vpack.c.bf16 %v706_v52, %v705_v50  ;;  %v708_v10 = vmul.f32 %v700_v3, %v644_v39  ;;  %v702_v19 = vadd.f32 1.0, %v1786_v58  ;;  %v842_v49 = vsel %vm491_vm2, %v834_v42, %v836_v48 }
  0xfa   : > { %v709_v24 = vmul.f32 %v701_v18, %v645_v20  ;;  %865 = vmatpush.bf16.msrb.mxu1 %v842_v49  ;;  %v786_v52 = vrot.slane %v504_v43, 3  ;;  %v792_v6 = vperm.slane %v784_v4, 0 }
  0xfb   : > { %1621 = vmatmul.msk.bf16.vlgmr.msrb.gmra.mxu0 %vm741_vm3, %v713_v55  ;;  %v714_v45 = vpack.c.bf16 %v708_v10, %v707_v9  ;;  %v710_v27 = vmul.f32 %v702_v19, %v646_v25  ;;  %v790_v55 = vrot.slane %v504_v43, 7 }
  0xfc   : > { %v794_v30 = vperm.slane %v786_v52, 0 }
  0xfd   : > { %v715_v31 = vpack.c.bf16 %v710_v27, %v709_v24  ;;  %v1788_v34 = vpop.eup %1787  ;;  %v798_v61 = vperm.slane %v790_v55, 0 }
  0xfe   : > { %v1790_v35 = vpop.eup %1789  ;;  %v703_v36 = vadd.f32 1.0, %v1788_v34  ;;  %v922_v34 = vpop.permute.xlu0 %921 }
  0xff   : > { %v704_v33 = vadd.f32 1.0, %v1790_v35  ;;  %v920_v35 = vpop.permute.xlu1 %919 }
 0x100   : > { %v711_v40 = vmul.f32 %v703_v36, %v647_v37  ;;  %v924_v16 = vpop.permute.xlu2 %923  ;;  %v887_v37 = vperm.slane %v2302_v15, 2 }
 0x101   : > { %v712_v41 = vmul.f32 %v704_v33, %v648_v38  ;;  %945 = vmatpush.bf16.msrb.mxu2 %v924_v16 }
 0x103   : > { %v716_v28 = vpack.c.bf16 %v712_v41, %v711_v40  ;;  %v896_v40 = vperm.slane %v2302_v15, 3 }
 0x105   : > { %946 = vmatpush.bf16.msrb.mxu2 %v922_v34 }
 0x108   : > { %v918_v36 = vpop.permute.xlu2 %917 }
 0x109   : > { %947 = vmatpush.bf16.msrb.mxu2 %v920_v35 }
 0x10b   : > { %1622 = vmatmul.msk.bf16.gmra.mxu0 %vm741_vm3, %v714_v45 }
 0x10d   : > { %948 = vmatpush.bf16.msrb.mxu2 %v918_v36 }
 0x11b   : > { %1623 = vmatmul.msk.bf16.gmra.mxu0 %vm741_vm3, %v715_v31 }
 0x12b   : > { %1624 = vmatmul.msk.bf16.gmra.mxu0 %vm741_vm3, %v716_v28 }
 0x143   : > { %v527_v46 = vpop.f32.mrf.mxu1 }
 0x144   : > { %v809_v62 = vsub.f32 %v793_v22, %v527_v46  ;;  %v810_v63 = vsub.f32 %v794_v30, %v527_v46  ;;  %v811_v29 = vsub.f32 %v795_v56, %v527_v46  ;;  %v812_v44 = vsub.f32 %v796_v59, %v527_v46 }
 0x145   : > { %v813_v0 = vsub.f32 %v797_v60, %v527_v46  ;;  %v814_v1 = vsub.f32 %v798_v61, %v527_v46  ;;  %v807_v7 = vsub.f32 %v791_v5, %v527_v46  ;;  %v808_v8 = vsub.f32 %v792_v6, %v527_v46 }
 0x14b   : > { %v529_v50 = vpop.f32.mrf.mxu1 }
 0x155   : > { %v2426_v2 = vpop.f32.mrf.mxu2 }
 0x15d   : > { %v548_v3 = vpop.f32.mrf.mxu2 }
 0x178   : > { %v2428_v39 = vpop.f32.mrf.mxu0 }
 0x179   : > { %v815_v10 = vadd.f32 %v807_v7, %v2428_v39 }
 0x180   : > { %v2430_v9 = vpop.f32.mrf.mxu0 }
 0x181   : > { %v816_v11 = vadd.f32 %v808_v8, %v2430_v9 }
 0x183   : > { %v823_v12 = vpack.c.bf16 %v816_v11, %v815_v10 }
 0x185   : > { %1633 = vmatmul.msk.bf16.vlgmr.msrb.gmra.mxu1 %vm491_vm2, %v823_v12 }
 0x188   : > { %v2435_v45 = vpop.f32.mrf.mxu0 }
 0x189   : > { %v817_v57 = vadd.f32 %v809_v62, %v2435_v45 }
 0x190   : > { %v2437_v13 = vpop.f32.mrf.mxu0 }
 0x191   : > { %v818_v14 = vadd.f32 %v810_v63, %v2437_v13 }
 0x193   : > { %v824_v58 = vpack.c.bf16 %v818_v14, %v817_v57 }
 0x195   : > { %1634 = vmatmul.msk.bf16.gmra.mxu1 %vm491_vm2, %v824_v58 }
 0x198   : > { %v2442_v17 = vpop.f32.mrf.mxu0 }
 0x199   : > { %v819_v19 = vadd.f32 %v811_v29, %v2442_v17 }
 0x1a0   : > { %v2444_v18 = vpop.f32.mrf.mxu0 }
 0x1a1   : > { %v820_v20 = vadd.f32 %v812_v44, %v2444_v18 }
 0x1a3   : > { %v825_v25 = vpack.c.bf16 %v820_v20, %v819_v19 }
 0x1a5   : > { %1635 = vmatmul.msk.bf16.gmra.mxu1 %vm491_vm2, %v825_v25 }
 0x1a8   : > { %v2449_v21 = vpop.f32.mrf.mxu0 }
 0x1a9   : > { %v821_v24 = vadd.f32 %v813_v0, %v2449_v21 }
 0x1b0   : > { %v2451_v23 = vpop.f32.mrf.mxu0 }
 0x1b1   : > { %v822_v27 = vadd.f32 %v814_v1, %v2451_v23 }
 0x1b3   : > { %v826_v31 = vpack.c.bf16 %v822_v27, %v821_v24 }
 0x1b5   : > { %1636 = vmatmul.msk.bf16.gmra.mxu1 %vm491_vm2, %v826_v31 }
 0x202   : > { %v867_v33 = vpop.f32.mrf.mxu1 }
 0x203   : > { %v888_v38 = vmul.f32 %v887_v37, %v867_v33 }
 0x205   : > { %v897_v26 = vadd.f32 %v896_v40, %v888_v38 }
 0x207   : > { %v905_v43 = vmax.f32 %v897_v26, 0.0 }
 0x20a   : > { %v869_v41 = vpop.f32.mrf.mxu1 }
 0x20b   : > { %v889_v28 = vmul.f32 %v887_v37, %v869_v41 }
 0x20d   : > { %v898_v42 = vadd.f32 %v896_v40, %v889_v28 }
 0x20f   : > { %v906_v46 = vmax.f32 %v898_v42, 0.0  ;;  %v1106_v42 = vadd.f32 %v2428_v39, %v2426_v2 }
 0x211   : > { %v913_v47 = vpack.c.bf16 %v906_v46, %v905_v43 }
 0x212   : > { %v872_v48 = vpop.f32.mrf.mxu1 }
 0x213   : > { %1637 = vmatmul.msk.bf16.vlgmr.msrb.gmra.mxu2 %vm741_vm3, %v913_v47  ;;  %v890_v49 = vmul.f32 %v887_v37, %v872_v48 }
 0x215   : > { %v899_v51 = vadd.f32 %v896_v40, %v890_v49 }
 0x217   : > { %v907_v53 = vmax.f32 %v899_v51, 0.0 }
 0x21a   : > { %v874_v50 = vpop.f32.mrf.mxu1 }
 0x21b   : > { %v891_v52 = vmul.f32 %v887_v37, %v874_v50 }
 0x21d   : > { %v900_v32 = vadd.f32 %v896_v40, %v891_v52 }
 0x21f   : > { %v908_v54 = vmax.f32 %v900_v32, 0.0 }
 0x221   : > { %v914_v55 = vpack.c.bf16 %v908_v54, %v907_v53 }
 0x222   : > { %v877_v22 = vpop.f32.mrf.mxu1 }
 0x223   : > { %1638 = vmatmul.msk.bf16.gmra.mxu2 %vm741_vm3, %v914_v55  ;;  %v892_v15 = vmul.f32 %v887_v37, %v877_v22 }
 0x225   : > { %v901_v56 = vadd.f32 %v896_v40, %v892_v15 }
 0x227   : > { %v909_v61 = vmax.f32 %v901_v56, 0.0 }
 0x22a   : > { %v879_v30 = vpop.f32.mrf.mxu1 }
 0x22b   : > { %v893_v59 = vmul.f32 %v887_v37, %v879_v30 }
 0x22d   : > { %v902_v60 = vadd.f32 %v896_v40, %v893_v59 }
 0x22f   : > { %v910_v62 = vmax.f32 %v902_v60, 0.0  ;;  %v1107_v60 = vadd.f32 %v2430_v9, %v2426_v2 }
 0x231   : > { %v915_v63 = vpack.c.bf16 %v910_v62, %v909_v61 }
 0x232   : > { %v882_v29 = vpop.f32.mrf.mxu1 }
 0x233   : > { %1639 = vmatmul.msk.bf16.gmra.mxu2 %vm741_vm3, %v915_v63  ;;  %v894_v44 = vmul.f32 %v887_v37, %v882_v29 }
 0x235   : > { %v903_v1 = vadd.f32 %v896_v40, %v894_v44 }
 0x237   : > { %v911_v5 = vmax.f32 %v903_v1, 0.0 }
 0x23a   : > { %v884_v0 = vpop.f32.mrf.mxu1 }
 0x23b   : > { %v895_v3 = vmul.f32 %v887_v37, %v884_v0 }
 0x23d   : > { %v904_v4 = vadd.f32 %v896_v40, %v895_v3 }
 0x23f   : > { %v912_v6 = vmax.f32 %v904_v4, 0.0 }
 0x241   : > { %v916_v7 = vpack.c.bf16 %v912_v6, %v911_v5 }
 0x243   : > { %1640 = vmatmul.msk.bf16.gmra.mxu2 %vm741_vm3, %v916_v7 }
 0x296   : > { %v950_v8 = vpop.f32.mrf.mxu2 }
 0x297   : > { %v970_v10 = vsel %vm491_vm2, %v950_v8, -inf }
 0x298   : > { %v971_v11 = vrot.slane %v970_v10, 4 }
 0x29a   : > { %v972_v12 = vmax.f32 %v970_v10, %v971_v11 }
 0x29c   : > { %v973_v57 = vrot.slane %v972_v12, 2 }
 0x29e   : > { %v974_v14 = vmax.f32 %v972_v12, %v973_v57  ;;  %v952_v58 = vpop.f32.mrf.mxu2 }
 0x29f   : > { %v977_v16 = vsel %vm491_vm2, %v952_v58, -inf }
 0x2a0   : > { %v975_v19 = vrot.slane %v974_v14, 1  ;;  %v978_v20 = vrot.slane %v977_v16, 4 }
 0x2a2   : > { %v976_v25 = vmax.f32 %v974_v14, %v975_v19  ;;  %v979_v24 = vmax.f32 %v977_v16, %v978_v20 }
 0x2a4   : > { %v1026_v27 = vsub.f32 %v950_v8, %v976_v25  ;;  %v980_v31 = vrot.slane %v979_v24, 2 }
 0x2a6   : > { %v1034_v34 = vmul.f32 1.442695, %v1026_v27  ;;  %v981_v35 = vmax.f32 %v979_v24, %v980_v31  ;;  %v955_v36 = vpop.f32.mrf.mxu2  ;;  %v1108_v24 = vadd.f32 %v2435_v45, %v2426_v2 }
 0x2a7   : > { %v984_v33 = vsel %vm491_vm2, %v955_v36, -inf }
 0x2a8   : > { %1791 = vpow2.f32 %v1034_v34  ;;  %v982_v37 = vrot.slane %v981_v35, 1  ;;  %v985_v38 = vrot.slane %v984_v33, 4 }
 0x2aa   : > { %v983_v40 = vmax.f32 %v981_v35, %v982_v37  ;;  %v986_v41 = vmax.f32 %v984_v33, %v985_v38 }
 0x2ac   : > { %v1027_v26 = vsub.f32 %v952_v58, %v983_v40  ;;  %v987_v28 = vrot.slane %v986_v41, 2 }
 0x2ae   : > { %v1792_v43 = vpop.eup %1791  ;;  %v1036_v46 = vmul.f32 1.442695, %v1027_v26  ;;  %v988_v47 = vmax.f32 %v986_v41, %v987_v28  ;;  %v957_v48 = vpop.f32.mrf.mxu2 }
 0x2af   : > { %v1050_v49 = vsel %vm491_vm2, %v1792_v43, 0.0  ;;  %v1114_v50 = vmul.f32 %v1792_v43, %v1106_v42  ;;  %v991_v51 = vsel %vm491_vm2, %v957_v48, -inf }
 0x2b0   : > { %v1051_v52 = vrot.slane %v1050_v49, 4  ;;  %1793 = vpow2.f32 %v1036_v46  ;;  %v989_v32 = vrot.slane %v988_v47, 1  ;;  %v992_v53 = vrot.slane %v991_v51, 4 }
 0x2b1   : > { %v1122_v54 = vsel %vm491_vm2, %v1114_v50, 0.0 }
 0x2b2   : > { %v1052_v55 = vadd.f32 %v1051_v52, %v1050_v49  ;;  %v1123_v22 = vrot.slane %v1122_v54, 4  ;;  %v990_v15 = vmax.f32 %v988_v47, %v989_v32  ;;  %v993_v30 = vmax.f32 %v991_v51, %v992_v53 }
 0x2b4   : > { %v1053_v39 = vrot.slane %v1052_v55, 2  ;;  %v1028_v56 = vsub.f32 %v955_v36, %v990_v15  ;;  %v994_v59 = vrot.slane %v993_v30, 2  ;;  %v1124_v63 = vadd.f32 %v1123_v22, %v1122_v54 }
 0x2b5   : > { %v2500_v22 = vadd.f32 %v2442_v17, %v2426_v2 }
 0x2b6   : > { %v1794_v61 = vpop.eup %1793  ;;  %v1054_v62 = vadd.f32 %v1053_v39, %v1052_v55  ;;  %v1038_v29 = vmul.f32 1.442695, %v1028_v56  ;;  %v2472_v44 = vpop.f32.mrf.mxu2  ;;  %v995_v3 = vmax.f32 %v993_v30, %v994_v59  ;;  %v1125_v57 = vrot.slane %v1124_v63, 2 }
 0x2b7   : > { %v1057_v0 = vsel %vm491_vm2, %v1794_v61, 0.0  ;;  %v1115_v1 = vmul.f32 %v1794_v61, %v1107_v60  ;;  %v998_v4 = vsel %vm491_vm2, %v2472_v44, -inf  ;;  %v1109_v55 = vadd.f32 %v2437_v13, %v2426_v2 }
 0x2b8   : > { %v1055_v5 = vrot.slane %v1054_v62, 1  ;;  %v1058_v6 = vrot.slane %v1057_v0, 4  ;;  %1795 = vpow2.f32 %v1038_v29  ;;  %v996_v8 = vrot.slane %v995_v3, 1 }
 0x2b9   : > { %v1129_v7 = vsel %vm491_vm2, %v1115_v1, 0.0  ;;  %v999_v9 = vrot.slane %v998_v4, 4  ;;  %v1126_v34 = vadd.f32 %v1125_v57, %v1124_v63 }
 0x2ba   : > { %v2478_v10 = vadd.f32 %v1055_v5, %v1054_v62  ;;  %v1059_v11 = vadd.f32 %v1058_v6, %v1057_v0  ;;  %v1130_v12 = vrot.slane %v1129_v7, 4  ;;  %v997_v14 = vmax.f32 %v995_v3, %v996_v8 }
 0x2bb   : > { %v1000_v58 = vmax.f32 %v998_v4, %v999_v9  ;;  %v1127_v47 = vrot.slane %v1126_v34, 1 }
 0x2bc   : > { %1797 = vrcp.f32 %v2478_v10  ;;  %v1060_v16 = vrot.slane %v1059_v11, 2  ;;  %v1131_v19 = vadd.f32 %v1130_v12, %v1129_v7  ;;  %v1029_v20 = vsub.f32 %v957_v48, %v997_v14 }
 0x2bd   : > { %v1001_v27 = vrot.slane %v1000_v58, 2  ;;  %v1187_v59 = vand.u32 2147483647, %v2478_v10  ;;  %v1128_v63 = vadd.f32 %v1127_v47, %v1126_v34  ;;  %v1189_v13 = vand.u32 2147483648, %v2478_v10 }
 0x2be   : > { %v1796_v25 = vpop.eup %1795  ;;  %v2483_v31 = vpop.f32.mrf.mxu2  ;;  %v1061_v35 = vadd.f32 %v1060_v16, %v1059_v11  ;;  %v1040_v38 = vmul.f32 1.442695, %v1029_v20  ;;  %v1132_v26 = vrot.slane %v1131_v19, 2  ;;  %vm1183_vm5 = vweird.f32 %v2478_v10 }
 0x2bf   : > { %v1064_v36 = vsel %vm491_vm2, %v1796_v25, 0.0  ;;  %v1116_v37 = vmul.f32 %v1796_v25, %v1108_v24  ;;  %v1002_v40 = vmax.f32 %v1000_v58, %v1001_v27  ;;  %v1005_v28 = vsel %vm491_vm2, %v2483_v31, -inf }
 0x2c0   : > { %v1065_v33 = vrot.slane %v1064_v36, 4  ;;  %v1062_v41 = vrot.slane %v1061_v35, 1  ;;  %1799 = vpow2.f32 %v1040_v38  ;;  %v1006_v32 = vrot.slane %v1005_v28, 4 }
 0x2c1   : > { %v1136_v45 = vsel %vm491_vm2, %v1116_v37, 0.0  ;;  %v1003_v46 = vrot.slane %v1002_v40, 1  ;;  %v1133_v54 = vadd.f32 %v1132_v26, %v1131_v19  ;;  %vm2516_vm6 = vcmp.eq.f32.partialorder %v1187_v59, 8.507059e+37 }
 0x2c2   : > { %v2488_v42 = vpop.eup %1797  ;;  %v1066_v43 = vadd.f32 %v1065_v33, %v1064_v36  ;;  %v2493_v49 = vadd.f32 %v1062_v41, %v1061_v35  ;;  %v1137_v51 = vrot.slane %v1136_v45, 4  ;;  %v1007_v61 = vmax.f32 %v1005_v28, %v1006_v32 }
 0x2c3   : > { %v1179_v48 = vmul.f32 %v2488_v42, %v2478_v10  ;;  %v1004_v52 = vmax.f32 %v1002_v40, %v1003_v46  ;;  %vm1184_vm4 = vweird.f32 %v2488_v42  ;;  %v1134_v0 = vrot.slane %v1133_v54, 1 }
 0x2c4   : > { %v1067_v50 = vrot.slane %v1066_v43, 2  ;;  %1801 = vrcp.f32 %v2493_v49  ;;  %v1138_v30 = vadd.f32 %v1137_v51, %v1136_v45  ;;  %v1008_v11 = vrot.slane %v1007_v61, 2  ;;  %vm2522_vm7 = vmor %vm1183_vm5, %vm1184_vm4 }
 0x2c5   : > { %v1180_v53 = vsub.f32 1.0, %v1179_v48  ;;  %v1030_v60 = vsub.f32 %v2472_v44, %v1004_v52  ;;  %v1190_v57 = vor.u32 1.1754944e-38, %v1189_v13  ;;  %v1201_v58 = vand.u32 2147483647, %v2493_v49 }
 0x2c6   : > { %v1068_v15 = vadd.f32 %v1067_v50, %v1066_v43  ;;  %v2502_v39 = vpop.f32.mrf.mxu2  ;;  %v1800_v62 = vpop.eup %1799  ;;  %v1139_v5 = vrot.slane %v1138_v30, 2  ;;  %v1203_v19 = vand.u32 2147483648, %v2493_v49  ;;  %v1135_v25 = vadd.f32 %v1134_v0, %v1133_v54 }
 0x2c7   : > { %v1181_v56 = vmul.f32 %v2488_v42, %v1180_v53  ;;  %v1071_v1 = vsel %vm491_vm2, %v1800_v62, 0.0  ;;  %v1117_v3 = vmul.f32 %v1800_v62, %v1109_v55  ;;  %v1012_v44 = vsel %vm491_vm2, %v2502_v39, -inf }
 0x2c8   : > { %v1069_v29 = vrot.slane %v1068_v15, 1  ;;  %v1072_v6 = vrot.slane %v1071_v1, 4  ;;  %v1042_v9 = vmul.f32 1.442695, %v1030_v60  ;;  %v1013_v20 = vrot.slane %v1012_v44, 4 }
 0x2c9   : > { %v1182_v17 = vadd.f32 %v2488_v42, %v1181_v56  ;;  %v1143_v16 = vsel %vm491_vm2, %v1117_v3, 0.0  ;;  %v1140_v27 = vadd.f32 %v1139_v5, %v1138_v30  ;;  %vm1197_vm9 = vweird.f32 %v2493_v49 }
 0x2ca   : > { %v2511_v4 = vadd.f32 %v1069_v29, %v1068_v15  ;;  %v1802_v7 = vpop.eup %1801  ;;  %v1073_v34 = vadd.f32 %v1072_v6, %v1071_v1  ;;  %v1144_v35 = vrot.slane %v1143_v16, 4  ;;  %v1009_v36 = vmax.f32 %v1007_v61, %v1008_v11 }
 0x2cb   : > { %v1193_v14 = vmul.f32 %v1802_v7, %v2493_v49  ;;  %v1186_v10 = vsel %vm2522_vm7, %v2488_v42, %v1182_v17  ;;  %vm1198_vm10 = vweird.f32 %v1802_v7  ;;  %vm2539_vm11 = vcmp.eq.f32.partialorder %v1201_v58, 8.507059e+37 }
 0x2cc   : > { %1803 = vrcp.f32 %v2511_v4  ;;  %v1191_v37 = vsel %vm2516_vm6, %v1190_v57, %v1186_v10  ;;  %v1074_v40 = vrot.slane %v1073_v34, 2  ;;  %v1204_v26 = vor.u32 1.1754944e-38, %v1203_v19  ;;  %vm1199_vm12 = vmor %vm1197_vm9, %vm1198_vm10 }
 0x2cd   : > { %v1194_v24 = vsub.f32 1.0, %v1193_v14  ;;  %1805 = vpow2.f32 %v1042_v9  ;;  %v1010_v28 = vrot.slane %v1009_v36, 1  ;;  %v1014_v42 = vmax.f32 %v1012_v44, %v1013_v20 }
 0x2ce   : > { %v2535_v33 = vpop.f32.mrf.mxu2  ;;  %v1141_v45 = vrot.slane %v1140_v27, 1  ;;  %v1075_v46 = vadd.f32 %v1074_v40, %v1073_v34  ;;  %v1290_v50 = vmul.f32 %v1191_v37, %v1128_v63  ;;  %v1215_v51 = vand.u32 2147483647, %v2511_v4 }
 0x2cf   : > { %v1195_v38 = vmul.f32 %v1802_v7, %v1194_v24  ;;  %v1019_v47 = vsel %vm491_vm2, %v2535_v33, -inf  ;;  %v1145_v52 = vadd.f32 %v1144_v35, %v1143_v16  ;;  %v1011_v32 = vmax.f32 %v1009_v36, %v1010_v28 }
 0x2d0   : > { %v1217_v55 = vand.u32 2147483648, %v2511_v4  ;;  %v1076_v15 = vrot.slane %v1075_v46, 1  ;;  %v1015_v60 = vrot.slane %v1014_v42, 2  ;;  %v1020_v61 = vrot.slane %v1019_v47, 4 }
 0x2d1   : > { %v1196_v43 = vadd.f32 %v1802_v7, %v1195_v38  ;;  %v1031_v59 = vsub.f32 %v2483_v31, %v1011_v32  ;;  %v1146_v29 = vrot.slane %v1145_v52, 2  ;;  %v1142_v31 = vadd.f32 %v1141_v45, %v1140_v27 }
 0x2d2   : > { %v1804_v48 = vpop.eup %1803  ;;  %v2553_v63 = vadd.f32 %v1076_v15, %v1075_v46  ;;  %vm1211_vm14 = vweird.f32 %v2511_v4  ;;  %v1016_v8 = vmax.f32 %v1014_v42, %v1015_v60  ;;  %v1218_v9 = vor.u32 1.1754944e-38, %v1217_v55 }
 0x2d3   : > { %v1200_v53 = vsel %vm1199_vm12, %v1802_v7, %v1196_v43  ;;  %v1207_v54 = vmul.f32 %v1804_v48, %v2511_v4  ;;  %v1806_v30 = vpop.eup %1805  ;;  %v1044_v1 = vmul.f32 1.442695, %v1031_v59  ;;  %vm1212_vm13 = vweird.f32 %v1804_v48 }
 0x2d4   : > { %v1205_v56 = vsel %vm2539_vm11, %v1204_v26, %v1200_v53  ;;  %v1078_v13 = vsel %vm491_vm2, %v1806_v30, 0.0  ;;  %v1118_v0 = vmul.f32 %v1806_v30, %v2500_v22  ;;  %1807 = vrcp.f32 %v2553_v63  ;;  %vm1213_vm15 = vmor %vm1211_vm14, %vm1212_vm13 }
 0x2d5   : > { %v1291_v49 = vmul.f32 %v1205_v56, %v1135_v25  ;;  %v1208_v62 = vsub.f32 1.0, %v1207_v54  ;;  %v1079_v17 = vrot.slane %v1078_v13, 4  ;;  %1809 = vpow2.f32 %v1044_v1 }
 0x2d6   : > { %v1150_v7 = vsel %vm491_vm2, %v1118_v0, 0.0  ;;  %v1147_v11 = vadd.f32 %v1146_v29, %v1145_v52  ;;  %vm1216_vm0 = vcmp.eq.f32.partialorder %v1215_v51, 8.507059e+37  ;;  %v1017_v14 = vrot.slane %v1016_v8, 1 }
 0x2d7   : > { %v1307_v3 = vsel %vm1306_vm8, %v1291_v49, %v1290_v50  ;;  %v1209_v5 = vmul.f32 %v1804_v48, %v1208_v62  ;;  %v1080_v6 = vadd.f32 %v1079_v17, %v1078_v13  ;;  %v1151_v12 = vrot.slane %v1150_v7, 4 }
 0x2d8   : > { %v1021_v58 = vmax.f32 %v1019_v47, %v1020_v61  ;;  %v1111_v4 = vadd.f32 %v2444_v18, %v2426_v2  ;;  %v1018_v25 = vmax.f32 %v1016_v8, %v1017_v14  ;;  %v1148_v27 = vrot.slane %v1147_v11, 1 }
 0x2d9   : > { %v1210_v44 = vadd.f32 %v1804_v48, %v1209_v5  ;;  %v1081_v22 = vrot.slane %v1080_v6, 2  ;;  %v1152_v36 = vadd.f32 %v1151_v12, %v1150_v7  ;;  %v1229_v40 = vand.u32 2147483647, %v2553_v63 }
 0x2da   : > { %v1808_v19 = vpop.eup %1807  ;;  %v1022_v24 = vrot.slane %v1021_v58, 2  ;;  %v1032_v41 = vsub.f32 %v2502_v39, %v1018_v25  ;;  %v1231_v42 = vand.u32 2147483648, %v2553_v63  ;;  %vm1225_vm5 = vweird.f32 %v2553_v63 }
 0x2db   : > { %v1214_v57 = vsel %vm1213_vm15, %v1804_v48, %v1210_v44  ;;  %v1082_v10 = vadd.f32 %v1081_v22, %v1080_v6  ;;  %v1221_v34 = vmul.f32 %v1808_v19, %v2553_v63  ;;  %v1810_v37 = vpop.eup %1809  ;;  %vm1226_vm4 = vweird.f32 %v1808_v19 }
 0x2dc   : > { %v1219_v16 = vsel %vm1216_vm0, %v1218_v9, %v1214_v57  ;;  %v1023_v26 = vmax.f32 %v1021_v58, %v1022_v24  ;;  %v1085_v18 = vsel %vm491_vm2, %v1810_v37, 0.0  ;;  %v1119_v46 = vmul.f32 %v1810_v37, %v1111_v4  ;;  %vm1227_vm6 = vmor %vm1225_vm5, %vm1226_vm4 }
 0x2dd   : > { %v1292_v20 = vmul.f32 %v1219_v16, %v1142_v31  ;;  %v1083_v35 = vrot.slane %v1082_v10, 1  ;;  %v1222_v28 = vsub.f32 1.0, %v1221_v34  ;;  %v1086_v45 = vrot.slane %v1085_v18, 4 }
 0x2de   : > { %v1046_v47 = vmul.f32 1.442695, %v1032_v41  ;;  %v1024_v48 = vrot.slane %v1023_v26, 1  ;;  %v1153_v51 = vrot.slane %v1152_v36, 2  ;;  %v1157_v39 = vsel %vm491_vm2, %v1119_v46, 0.0 }
 0x2df   : > { %v1309_v38 = vsel %vm1308_vm1, %v1292_v20, %v1307_v3  ;;  %v1084_v43 = vadd.f32 %v1083_v35, %v1082_v10  ;;  %v1223_v50 = vmul.f32 %v1808_v19, %v1222_v28  ;;  %v1087_v52 = vadd.f32 %v1086_v45, %v1085_v18  ;;  %v1329_v28 = vpop.permute.xlu1 %1328 }
 0x2e0   : > { %v1232_v53 = vor.u32 1.1754944e-38, %v1231_v42  ;;  %vm1310_vm7 = vcmask 1043459   ;;  %v1025_v55 = vmax.f32 %v1023_v26, %v1024_v48  ;;  %v1149_v15 = vadd.f32 %v1148_v27, %v1147_v11  ;;  %v1331_v27 = vpop.permute.xlu0 %1330 }
 0x2e1   : > { %1811 = vrcp.f32 %v1084_v43  ;;  %v1224_v32 = vadd.f32 %v1808_v19, %v1223_v50  ;;  %v1088_v54 = vrot.slane %v1087_v52, 2  ;;  %vm1230_vm8 = vcmp.eq.f32.partialorder %v1229_v40, 8.507059e+37  ;;  %1343 = vmatpush.bf16.msra.mxu3 %v1331_v27 }
 0x2e2   : > { %1813 = vpow2.f32 %v1046_v47  ;;  %v1154_v56 = vadd.f32 %v1153_v51, %v1152_v36  ;;  %v1158_v61 = vrot.slane %v1157_v39, 4  ;;  %v1033_v49 = vsub.f32 %v2535_v33, %v1025_v55 }
 0x2e3   : > { %v1228_v30 = vsel %vm1227_vm6, %v1808_v19, %v1224_v32  ;;  %v1089_v60 = vadd.f32 %v1088_v54, %v1087_v52  ;;  %v1112_v1 = vadd.f32 %v2449_v21, %v2426_v2  ;;  %v1245_v8 = vand.u32 2147483648, %v1084_v43 }
 0x2e4   : > { %v1233_v59 = vsel %vm1230_vm8, %v1232_v53, %v1228_v30  ;;  %v1048_v17 = vmul.f32 1.442695, %v1033_v49  ;;  %v1155_v5 = vrot.slane %v1154_v56, 1  ;;  %v1159_v44 = vadd.f32 %v1158_v61, %v1157_v39 }
 0x2e5   : > { %v1293_v13 = vmul.f32 %v1233_v59, %v1149_v15  ;;  %v1090_v29 = vrot.slane %v1089_v60, 1  ;;  %v1243_v22 = vand.u32 2147483647, %v1084_v43  ;;  %vm1239_vm10 = vweird.f32 %v1084_v43  ;;  %1344 = vmatpush.bf16.msra.mxu3 %v1329_v28 }
 0x2e6   : > { %1815 = vpow2.f32 %v1048_v17  ;;  %v1160_v21 = vrot.slane %v1159_v44, 2  ;;  %v1246_v14 = vor.u32 1.1754944e-38, %v1245_v8  ;;  %v1156_v10 = vadd.f32 %v1155_v5, %v1154_v56 }
 0x2e7   : > { %v1812_v62 = vpop.eup %1811  ;;  %v1311_v3 = vsel %vm1310_vm7, %v1293_v13, %v1309_v38  ;;  %v1091_v6 = vadd.f32 %v1090_v29, %v1089_v60  ;;  %vm1244_vm12 = vcmp.eq.f32.partialorder %v1243_v22, 8.507059e+37  ;;  %v1113_v20 = vadd.f32 %v2451_v23, %v2426_v2 }
 0x2e8   : > { %v1235_v63 = vmul.f32 %v1812_v62, %v1084_v43  ;;  %v1814_v0 = vpop.eup %1813  ;;  %vm1240_vm9 = vweird.f32 %v1812_v62  ;;  %vm1312_vm13 = vcmask 1044484   ;;  %v1161_v36 = vadd.f32 %v1160_v21, %v1159_v44 }
 0x2e9   : > { %v1092_v7 = vsel %vm491_vm2, %v1814_v0, 0.0  ;;  %v1120_v33 = vmul.f32 %v1814_v0, %v1112_v1  ;;  %1817 = vrcp.f32 %v1091_v6  ;;  %vm1241_vm11 = vmor %vm1239_vm10, %vm1240_vm9  ;;  %v1259_v46 = vand.u32 2147483648, %v1091_v6 }
 0x2ea   : > { %v1236_v31 = vsub.f32 1.0, %v1235_v63  ;;  %v1093_v9 = vrot.slane %v1092_v7, 4  ;;  %v1162_v23 = vrot.slane %v1161_v36, 1  ;;  %v1257_v50 = vand.u32 2147483647, %v1091_v6 }
 0x2eb   : > { %v1164_v16 = vsel %vm491_vm2, %v1120_v33, 0.0  ;;  %vm1253_vm15 = vweird.f32 %v1091_v6  ;;  %v1260_v39 = vor.u32 1.1754944e-38, %v1259_v46  ;;  %vm1314_vm4 = vcmask 1045509  }
 0x2ec   : > { %v1237_v11 = vmul.f32 %v1812_v62, %v1236_v31  ;;  %v1094_v12 = vadd.f32 %v1093_v9, %v1092_v7  ;;  %v1816_v4 = vpop.eup %1815  ;;  %v1165_v37 = vrot.slane %v1164_v16, 4  ;;  %v1163_v55 = vadd.f32 %v1162_v23, %v1161_v36 }
 0x2ed   : > { %v1099_v38 = vsel %vm491_vm2, %v1816_v4, 0.0  ;;  %v1121_v43 = vmul.f32 %v1816_v4, %v1113_v20  ;;  %vm1258_vm1 = vcmp.eq.f32.partialorder %v1257_v50, 8.507059e+37  ;;  %vm1316_vm9 = vcmask 1046534  }
 0x2ee   : > { %v1238_v57 = vadd.f32 %v1812_v62, %v1237_v11  ;;  %v1095_v58 = vrot.slane %v1094_v12, 2  ;;  %v1100_v26 = vrot.slane %v1099_v38, 4  ;;  %v1166_v47 = vadd.f32 %v1165_v37, %v1164_v16 }
 0x2ef   : > { %v1818_v34 = vpop.eup %1817  ;;  %v1171_v52 = vsel %vm491_vm2, %v1121_v43, 0.0  ;;  %v1367_v43 = vpop.permute.xlu2 %1366 }
 0x2f0   : > { %v1242_v19 = vsel %vm1241_vm11, %v1812_v62, %v1238_v57  ;;  %v1096_v24 = vadd.f32 %v1095_v58, %v1094_v12  ;;  %v1249_v40 = vmul.f32 %v1818_v34, %v1091_v6  ;;  %v1101_v2 = vadd.f32 %v1100_v26, %v1099_v38  ;;  %v1826_v38 = vld [vmem:[#allocation2] sm:$0xff]  ;;  %1379 = vmatpush.bf16.msrb.mxu3 %v1367_v43 }
 0x2f1   : > { %v1247_v25 = vsel %vm1244_vm12, %v1246_v14, %v1242_v19  ;;  %vm1254_vm14 = vweird.f32 %v1818_v34  ;;  %v1167_v53 = vrot.slane %v1166_v47, 2  ;;  %v1172_v30 = vrot.slane %v1171_v52, 4 }
 0x2f2   : > { %v1294_v35 = vmul.f32 %v1247_v25, %v1156_v10  ;;  %v1097_v41 = vrot.slane %v1096_v24, 1  ;;  %v1250_v18 = vsub.f32 1.0, %v1249_v40  ;;  %v1102_v51 = vrot.slane %v1101_v2, 2  ;;  %vm1255_vm0 = vmor %vm1253_vm15, %vm1254_vm14 }
 0x2f3   : > { %v1168_v49 = vadd.f32 %v1167_v53, %v1166_v47  ;;  %v1173_v63 = vadd.f32 %v1172_v30, %v1171_v52  ;;  %vm1318_vm14 = vcmask 1047559  }
 0x2f4   : > { %v1313_v42 = vsel %vm1312_vm13, %v1294_v35, %v1311_v3  ;;  %v1098_v45 = vadd.f32 %v1097_v41, %v1096_v24  ;;  %v1251_v48 = vmul.f32 %v1818_v34, %v1250_v18  ;;  %v1103_v54 = vadd.f32 %v1102_v51, %v1101_v2  ;;  %v1825_v35 = vld [vmem:[%s2299_s25] sm:$0xff]  ;;  %v1365_v18 = vpop.permute.xlu0 %1364 }
 0x2f5   : > { %v1169_v1 = vrot.slane %v1168_v49, 1  ;;  %v1174_v31 = vrot.slane %v1173_v63, 2  ;;  %v1322_v36 = vperm.slane %v1825_v35, 7  ;;  %1380 = vmatpush.bf16.msrb.mxu3 %v1365_v18  ;;  %v1327_v23 = vperm.slane %v1825_v35, 4 }
 0x2f6   : > { %1819 = vrcp.f32 %v1098_v45  ;;  %v1252_v32 = vadd.f32 %v1818_v34, %v1251_v48  ;;  %v1104_v59 = vrot.slane %v1103_v54, 1  ;;  %v1273_v0 = vand.u32 2147483648, %v1098_v45 }
 0x2f7   : > { %v1271_v5 = vand.u32 2147483647, %v1098_v45  ;;  %vm1267_vm6 = vweird.f32 %v1098_v45  ;;  %v1170_v8 = vadd.f32 %v1169_v1, %v1168_v49  ;;  %v1175_v11 = vadd.f32 %v1174_v31, %v1173_v63  ;;  %v1361_v2 = vpop.permute.xlu2 %1360 }
 0x2f8   : > { %v1256_v15 = vsel %vm1255_vm0, %v1818_v34, %v1252_v32  ;;  %v1105_v13 = vadd.f32 %v1104_v59, %v1103_v54  ;;  %v1274_v44 = vor.u32 1.1754944e-38, %v1273_v0  ;;  %v473_v34 = vld [vmem:[%s2299_s25 + $0x8] sm:$0x3] }
 0x2f9   : > { %v1261_v56 = vsel %vm1258_vm1, %v1260_v39, %v1256_v15  ;;  %vm1272_vm8 = vcmp.eq.f32.partialorder %v1271_v5, 8.507059e+37  ;;  %v1176_v58 = vrot.slane %v1175_v11, 1  ;;  %v1324_v41 = vperm.slane %v473_v34, 0 }
 0x2fa   : > { %v1295_v61 = vmul.f32 %v1261_v56, %v1163_v55  ;;  %1821 = vrcp.f32 %v1105_v13  ;;  %v1287_v21 = vand.u32 2147483648, %v1105_v13  ;;  %v1285_v10 = vand.u32 2147483647, %v1105_v13 }
 0x2fb   : > { %vm1281_vm11 = vweird.f32 %v1105_v13  ;;  %v1177_v20 = vadd.f32 %v1176_v58, %v1175_v11  ;;  %v1389_v56 = vperm.slane %v473_v34, 1 }
 0x2fc   : > { %v1820_v60 = vpop.eup %1819  ;;  %v1315_v29 = vsel %vm1314_vm4, %v1295_v61, %v1313_v42  ;;  %v1288_v4 = vor.u32 1.1754944e-38, %v1287_v21  ;;  %vm1286_vm13 = vcmp.eq.f32.partialorder %v1285_v10, 8.507059e+37 }
 0x2fd   : > { %v1263_v62 = vmul.f32 %v1820_v60, %v1098_v45  ;;  %vm1268_vm5 = vweird.f32 %v1820_v60  ;;  %v1363_v45 = vpop.permute.xlu1 %1362 }
 0x2fe   : > { %vm1269_vm7 = vmor %vm1267_vm6, %vm1268_vm5  ;;  %1381 = vmatpush.bf16.msrb.mxu3 %v1363_v45 }
 0x2ff   : > { %v1264_v17 = vsub.f32 1.0, %v1263_v62 }
 0x300   : > { %v1822_v7 = vpop.eup %1821 }
 0x301   : > { %v1265_v3 = vmul.f32 %v1820_v60, %v1264_v17  ;;  %v1277_v22 = vmul.f32 %v1822_v7, %v1105_v13  ;;  %vm1282_vm10 = vweird.f32 %v1822_v7 }
 0x302   : > { %vm1283_vm12 = vmor %vm1281_vm11, %vm1282_vm10  ;;  %1382 = vmatpush.bf16.msrb.mxu3 %v1361_v2 }
 0x303   : > { %v1266_v6 = vadd.f32 %v1820_v60, %v1265_v3  ;;  %v1278_v57 = vsub.f32 1.0, %v1277_v22 }
 0x305   : > { %v1270_v9 = vsel %vm1269_vm7, %v1820_v60, %v1266_v6  ;;  %v1279_v16 = vmul.f32 %v1822_v7, %v1278_v57 }
 0x306   : > { %v1275_v33 = vsel %vm1272_vm8, %v1274_v44, %v1270_v9 }
 0x307   : > { %v1296_v12 = vmul.f32 %v1275_v33, %v1170_v8  ;;  %v1280_v19 = vadd.f32 %v1822_v7, %v1279_v16 }
 0x309   : > { %v1317_v14 = vsel %vm1316_vm9, %v1296_v12, %v1315_v29  ;;  %v1284_v25 = vsel %vm1283_vm12, %v1822_v7, %v1280_v19 }
 0x30a   : > { %v1289_v24 = vsel %vm1286_vm13, %v1288_v4, %v1284_v25 }
 0x30b   : > { %v1297_v27 = vmul.f32 %v1289_v24, %v1177_v20 }
 0x30d   : > { %v1319_v37 = vsel %vm1318_vm14, %v1297_v27, %v1317_v14 }
 0x30e   : > { %v1321_v40 = vadd.f32 %v1826_v38, %v1319_v37 }
 0x310   : > { %v1323_v26 = vmul.f32 %v1322_v36, %v1321_v40 }
 0x312   : > { %v1325_v28 = vadd.f32 %v1324_v41, %v1323_v26 }
 0x314   : > { %v1326_v42 = vpack.c.bf16 %v1325_v28, %v1325_v28 }
 0x316   : > { %1641 = vmatmul.msk.bf16.vlgmr.msra.gmra.mxu3 %vm491_vm2, %v1326_v42 }
 0x399   : > { %v1346_v46 = vpop.f32.mrf.mxu3 }
 0x39a   : > { %v1347_v47 = vadd.f32 %v1346_v46, %v1327_v23 }
 0x39c   : > { %v1351_v48 = vmul.f32 0.044715, %v1347_v47  ;;  %v1350_v54 = vmul.f32 0.5, %v1347_v47 }
 0x39e   : > { %v1352_v50 = vmul.f32 %v1351_v48, %v1347_v47 }
 0x3a0   : > { %v1353_v51 = vmul.f32 %v1352_v50, %v1347_v47 }
 0x3a1   : > { %v1348_v52 = vpop.f32.mrf.mxu3 }
 0x3a2   : > { %v1354_v32 = vadd.f32 %v1353_v51, %v1347_v47 }
 0x3a4   : > { %v1355_v39 = vmul.f32 0.7978846, %v1354_v32 }
 0x3a6   : > { %1823 = vtanh.f32 %v1355_v39 }
 0x3ac   : > { %v1824_v53 = vpop.eup %1823 }
 0x3ad   : > { %v1357_v55 = vadd.f32 1.0, %v1824_v53 }
 0x3af   : > { %v1358_v15 = vmul.f32 %v1357_v55, %v1350_v54 }
 0x3b1   : > { %v1359_v30 = vpack.c.bf16 %v1358_v15, %v1358_v15 }
 0x3b3   : > { %1642 = vmatmul.msk.bf16.vlgmr.msrb.gmra.mxu3 %vm741_vm3, %v1359_v30 }
 0x436   : > { %v1384_v59 = vpop.f32.mrf.mxu3 }
 0x437   : > { %v1388_v60 = vadd.f32 %v1384_v59, %v1321_v40 }
 0x439   : > { %v1390_v61 = vadd.f32 %v1389_v56, %v1388_v60 }
 0x43b   : > { %1391 = vst.msk [vmem:[#allocation2] sm:$0xff] %vm491_vm2, %v1390_v61 }
 0x43c   : > { %1392 = vst.msk [vmem:[%s2270_s4] sm:$0xff] %vm491_vm2, %v1390_v61 }
 0x43d   : > { %1974 = shalt.err (!%p1971_p0)
}
 0x43e   : > { %1673 = dma.vmem_to_hbm [thread:$0]  (%p2212_p2), %s1407_s18, 128, %s1409_s5, %s1394_s26   ;;  %v1386_v49 = vpop.f32.mrf.mxu3 }
 0x43f PF: > { %s2668_s24 = sld [smem:[#allocation16_spill]]  ;;  %p1700_p5 = scmp.ge.s32.totalorder %s2053_s12, 2 }
 0x441   : > { %p1690_p6 = pnand %p1700_p5, %p2216_p4 }
 0x443   : > { %p1691_p7 = pneg %p1690_p6 }
 0x445   : > { %s1420_s22 = sand.u32 1, %s2668_s24  }
 0x446   : > { %s1421_s10 = scalar_lea.sflag [#allocation5], %s1420_s22 }
 0x447   : > { %2020 = dma.done.wait (%p1691_p7), %s1421_s10, 128  }
 0x448   : > { %2022 = vsyncadd (%p1691_p7), %s1421_s10, 4294967168  ;;  %s26_s12 = sadd.s32 1, %s2053_s12   ;;  %s2670_s30 = sld [smem:[#allocation17_spill]] }
 0x449   : > { %p23_p3 = scmp.ge.s32.totalorder %s26_s12, 6   ;;  %s2671_s10 = sld [smem:[#allocation18_spill]] }
 0x44a   : > { %s2672_s27 = smov %s2029_s28  ;;  %s2673_s28 = smov %s2033_s29 }
 0x44b   : > { %s2674_s29 = smov %s2225_s20  ;;  %s2675_s9 = smov %s2049_s11 }
 0x44c   : > { %s2676_s11 = smov %s2682_s15  ;;  %25 = sbr.rel (!%p23_p3) target bundleno = 13 (0xd), region = 126 }
 0x451   :  { %1427 = vsyncpa [#allocation4], 1 }
 0x452   :  { %1429 = vsyncpa [#allocation4 + $0x1], 1 }
 0x453   :  { %1430 = vsyncpa [#allocation7], 1 }
 0x454   :  { %1431 = vsyncpa [#allocation10], 1 }
 0x455   :  { %1432 = vsyncpa [#allocation5], 1 }
 0x456   :  { %1434 = vsyncpa [#allocation5 + $0x1], 1 }

</bundles_post_ra>
